<compile_context>
chip_gen: v7x
topology: tpu7x:2x2x1
jax: 0.10.0
libtpu: 0.0.40
codegen_flags: <defaults>
</compile_context>

<pallas_src>
import jax
import jax.numpy as jnp
from jax.experimental import pallas as pl
from jax.experimental.pallas import tpu as pltpu

MAX_FACES = 15
PAD_FACES = 16               # 15 faces padded to 16 (sublane aligned); padded slot always masked
GLOBAL_FEAT_DIM = 2208       # DenseNet161 trunk channels (hard-coded by global_fc_main)
PADDED_FEAT = 2304           # 2208 zero-padded to a multiple of 256 (MXU-aligned K)
POOLED_HW = 7                # trunk spatial size before the 7x7 avg-pool
FC_MAIN_DIM = 256
ATT_HIDDEN = 64
NUM_CLASSES = 3
D_FACE = 64                  # stub non_align_model input feature width
BN_EPS = 1e-5
INV_BN = float(1.0 / (1.0 + BN_EPS) ** 0.5)   # eval-mode BN scale (running mean 0, var 1)
NEG_INF = -1e30


def _round_up(x, m):
    return ((x + m - 1) // m) * m


def _face_attention_kernel(
    pooled_ref,                 # (Bb, 2304)   bf16  relu + 7x7-avg-pooled trunk features (zero-padded)
    faces_ref,                  # (Bb, 16, 64) bf16  face_features_initial (padded faces)
    valid_ref,                  # (Bb, 16)     f32   1.0 for face slots < min(numberFaces, 15)
    w_main_ref, b_main_ref,     # (2304, 256) bf16, (1, 256) f32   global_fc_main (zero-padded K)
    w_comb_ref, b_comb_ref,     # (1, 64) f32, (1, 1) f32          w_na∘attentionfc1∘fc2 folded
    w_na_ref, b_na_ref,         # (64, 256) f32, (1, 256) f32      non_align_model stub
    w3_face_ref, w3_glob_ref,   # (256, 3) f32, (256, 3) f32       global_fc3_debug halves (BN-scaled)
    b3_ref,                     # (1, 3) f32
    out_ref,                    # (Bb, 3) f32
):
    # ---- global path: global_fc_main (dropout = identity in eval mode). Dominant MXU matmul.
    global_feat = jnp.dot(pooled_ref[...], w_main_ref[...],
                          preferred_element_type=jnp.float32) + b_main_ref[...]      # (Bb, 256)

    faces = faces_ref[...].astype(jnp.float32)                                       # (Bb, 16, 64)
    valid = valid_ref[...]                                                            # (Bb, 16)

    # ---- attention logits straight from raw faces (exact: non_align stub is linear and the
    #      reference has no nonlinearity between attentionfc1 and attentionfc2).
    #      VPU multiply + lane-reduce over the 64-wide face axis; no N=1 MXU matmul.
    w_comb = w_comb_ref[...]                                                          # (1, 64)
    logits = jnp.sum(faces * w_comb[:, None, :], axis=-1) + b_comb_ref[...]           # (Bb, 16)

    # ---- masked softmax over face slots (2-D layout; padded 16th slot always invalid)
    masked = jnp.where(valid > 0.0, logits, jnp.float32(NEG_INF))
    m = jnp.max(masked, axis=-1, keepdims=True)
    e = jnp.exp(masked - m)
    attn = e / jnp.sum(e, axis=-1, keepdims=True)                                     # (Bb, 16)
    # maxNumber == 0  ->  attention weights forced to zero (as in the PyTorch loop);
    # multiplying by `valid` also zeroes any residual mass on masked slots.
    attn = attn * valid

    # ---- attention-weighted face average in raw 64-d face space, then one small matmul:
    #      attn^T (X W_na + b_na) == (attn^T X) W_na + sum(attn) * b_na
    weighted = jnp.sum(attn[:, :, None] * faces, axis=1)                              # (Bb, 64)
    sum_attn = jnp.sum(attn, axis=-1, keepdims=True)                                  # (Bb, 1): 1 or 0
    attended = jnp.dot(weighted, w_na_ref[...],
                       preferred_element_type=jnp.float32) + sum_attn * b_na_ref[...]  # (Bb, 256)

    # ---- BatchNorm1d(affine=False), eval mode: the 1/sqrt(1+eps) scale is folded into w3_*
    # TODO(synk): training-mode batch statistics + stochastic dropout not reproduced.
    out_ref[...] = (
        jnp.dot(attended, w3_face_ref[...], preferred_element_type=jnp.float32)
        + jnp.dot(global_feat, w3_glob_ref[...], preferred_element_type=jnp.float32)
        + b3_ref[...]
    )


def face_attention_pallas(pooled, faces, number_faces, params, block_b=512):
    """pooled: (B, 2208) f32; faces: (B, 15, D_FACE) f32; number_faces: (B,) int."""
    B = pooled.shape[0]
    b_pad_min = _round_up(B, 8)
    b_blk = min(block_b, b_pad_min)                  # batch rows per grid step (multiple of 8)
    # v7x has 2 TensorCores: once the batch is big enough, make sure the "parallel"
    # grid has at least 2 steps so both cores get work.
    if b_pad_min // b_blk < 2 and b_pad_min >= 16:
        b_blk = _round_up((b_pad_min + 1) // 2, 8)
    b_pad = _round_up(B, b_blk)

    # validity mask: slot i is valid iff i < min(numberFaces, 15) (matches the reference
    # mask construction); padded batch rows / padded 16th slot are always invalid.
    nf = jnp.clip(number_faces.astype(jnp.float32), 0.0, float(MAX_FACES))
    face_idx = jnp.arange(PAD_FACES, dtype=jnp.float32)
    valid = (face_idx[None, :] < nf[:, None]).astype(jnp.float32)                 # (B, 16)

    if b_pad != B:
        pad = b_pad - B
        pooled = jnp.pad(pooled, ((0, pad), (0, 0)))
        faces = jnp.pad(faces, ((0, pad), (0, 0), (0, 0)))
        valid = jnp.pad(valid, ((0, pad), (0, 0)))
    # pad the face axis 15 -> 16 (padded slot always masked via `valid`)
    faces = jnp.pad(faces, ((0, 0), (0, PAD_FACES - MAX_FACES), (0, 0)))
    # pad the global feature dim 2208 -> 2304 (MXU-aligned K; zero pad is exact)
    pooled = jnp.pad(pooled, ((0, 0), (0, PADDED_FEAT - GLOBAL_FEAT_DIM)))
    w_main = jnp.pad(params["w_main"], ((0, PADDED_FEAT - GLOBAL_FEAT_DIM), (0, 0)))

    pooled_bf = pooled.astype(jnp.bfloat16)
    faces_bf = faces.astype(jnp.bfloat16)

    # fold attentionfc1 @ attentionfc2 (no nonlinearity in between -> exact composition),
    # then fold the non_align stub weight in front of it (linearity).
    w_a2_col = params["w_a2"].reshape(ATT_HIDDEN, 1)
    w_att_col = params["w_a1"] @ w_a2_col                               # (256, 1)
    b_att = params["b_a1"] @ w_a2_col + params["b_a2"]                  # (1, 1)
    w_comb = (params["w_na"] @ w_att_col).reshape(1, D_FACE)            # (1, 64)
    b_comb = params["b_na"] @ w_att_col + b_att                         # (1, 1)

    # fold the eval-mode BN scale into the classifier halves (exact: running mean is 0)
    w3_face = params["w3_face"] * INV_BN
    w3_glob = params["w3_glob"] * INV_BN

    weights = (
        w_main.astype(jnp.bfloat16), params["b_main"],
        w_comb, b_comb,
        params["w_na"], params["b_na"],
        w3_face, w3_glob, params["b3"],
    )

    def const_spec(arr):
        nd = arr.ndim
        return pl.BlockSpec(tuple(arr.shape), lambda b, _nd=nd: (0,) * _nd)

    in_specs = [
        pl.BlockSpec((b_blk, PADDED_FEAT), lambda b: (b, 0)),
        pl.BlockSpec((b_blk, PAD_FACES, D_FACE), lambda b: (b, 0, 0)),
        pl.BlockSpec((b_blk, PAD_FACES), lambda b: (b, 0)),
    ] + [const_spec(w) for w in weights]

    out = pl.pallas_call(
        _face_attention_kernel,
        grid=(b_pad // b_blk,),
        in_specs=in_specs,
        out_specs=pl.BlockSpec((b_blk, NUM_CLASSES), lambda b: (b, 0)),
        out_shape=jax.ShapeDtypeStruct((b_pad, NUM_CLASSES), jnp.float32),
        compiler_params=pltpu.CompilerParams(
            dimension_semantics=("parallel",),
            vmem_limit_bytes=48 * 1024 * 1024,   # covers v5e 16MiB default, < v7x 64MiB physical
        ),
    )(pooled_bf, faces_bf, valid, *weights)
    return out[:B]


def face_attention_forward(params, image, face_features_initial, numberFaces, labels):
    del labels  # only consumed by the external non_align_model (stubbed as a linear)
    B, C = image.shape[0], image.shape[1]
    # TODO(synk): external DenseNet161 trunk (global_model) replaced by a deterministic
    # stub: 2x2 average pool + 1x1 channel matmul -> 2208-channel 7x7 trunk features.
    x = image.reshape(B, C, POOLED_HW, 2, POOLED_HW, 2).mean(axis=(3, 5))   # (B, C, 7, 7)
    feats = jnp.einsum("bchw,co->bhwo", x, params["w_stub"])                # (B, 7, 7, 2208)
    # FaceAttention prologue (relu + 7x7 avg-pool) fused here so only the (B, 2208)
    # pooled features (49x smaller than the trunk map) ever enter the Pallas kernel.
    pooled = jnp.mean(jax.nn.relu(feats), axis=(1, 2))                      # (B, 2208)
    return face_attention_pallas(pooled, face_features_initial, numberFaces, params)


def init_params(key):
    ks = jax.random.split(key, 7)

    def kaiming_t(k, fan_in, fan_out):
        # matches nn.init.kaiming_normal_ (fan_in mode, gain sqrt(2)); stored transposed
        return jnp.sqrt(2.0 / fan_in) * jax.random.normal(k, (fan_in, fan_out), jnp.float32)

    w_fc3 = kaiming_t(ks[4], 2 * FC_MAIN_DIM, NUM_CLASSES)                  # (512, 3)
    return dict(
        # stub of the DenseNet trunk's 1x1 channel projection
        w_stub=0.05 * jax.random.normal(ks[0], (3, GLOBAL_FEAT_DIM), jnp.float32),
        # stub of non_align_model: Linear(D_FACE -> 256)
        w_na=kaiming_t(ks[1], D_FACE, FC_MAIN_DIM),
        b_na=jnp.full((1, FC_MAIN_DIM), 0.01, jnp.float32),
        # global_fc_main: Linear(2208 -> 256)
        w_main=kaiming_t(ks[2], GLOBAL_FEAT_DIM, FC_MAIN_DIM),
        b_main=jnp.full((1, FC_MAIN_DIM), 0.01, jnp.float32),
        # attentionfc1: Linear(256 -> 64)
        w_a1=kaiming_t(ks[3], FC_MAIN_DIM, ATT_HIDDEN),
        b_a1=jnp.full((1, ATT_HIDDEN), 0.01, jnp.float32),
        # attentionfc2: Linear(64 -> 1) (weight kept as a (1, 64) row)
        w_a2=kaiming_t(ks[5], ATT_HIDDEN, 1).reshape(1, ATT_HIDDEN),
        b_a2=jnp.full((1, 1), 0.01, jnp.float32),
        # global_fc3_debug: Linear(512 -> 3), split into face / global halves
        w3_face=w_fc3[:FC_MAIN_DIM],
        w3_glob=w_fc3[FC_MAIN_DIM:],
        b3=jnp.full((1, NUM_CLASSES), 0.01, jnp.float32),
    )


if __name__ == "__main__":
    key = jax.random.PRNGKey(0)
    k_img, k_face, k_par = jax.random.split(key, 3)

    B = 2
    image = jax.random.normal(k_img, (B, 3, 14, 14), jnp.float32)             # NCHW
    face_features_initial = jax.random.normal(k_face, (B, MAX_FACES, D_FACE), jnp.float32)
    numberFaces = jnp.array([4, 0], dtype=jnp.int32)   # includes the zero-face edge case
    labels = jnp.zeros((B,), jnp.int32)                # unused by the stubbed non_align_model

    params = init_params(k_par)
    fwd = jax.jit(face_attention_forward)
    out = jax.block_until_ready(fwd(params, image, face_features_initial, numberFaces, labels))

    assert out.shape == (B, NUM_CLASSES)
    assert bool(jnp.all(jnp.isfinite(out)))
    print("KERNEL_OK")
</pallas_src>

<mosaic_0001>
module attributes {stable_mosaic.version = 11 : i64} {
  func.func @_face_attention_kernel(%arg0: i32, %arg1: memref<8x2304xbf16, #tpu.memory_space<vmem>>, %arg2: memref<8x16x64xbf16, #tpu.memory_space<vmem>>, %arg3: memref<8x16xf32, #tpu.memory_space<vmem>>, %arg4: memref<2304x256xbf16, #tpu.memory_space<vmem>>, %arg5: memref<1x256xf32, #tpu.memory_space<vmem>>, %arg6: memref<1x64xf32, #tpu.memory_space<vmem>>, %arg7: memref<1x1xf32, #tpu.memory_space<vmem>>, %arg8: memref<64x256xf32, #tpu.memory_space<vmem>>, %arg9: memref<1x256xf32, #tpu.memory_space<vmem>>, %arg10: memref<256x3xf32, #tpu.memory_space<vmem>>, %arg11: memref<256x3xf32, #tpu.memory_space<vmem>>, %arg12: memref<1x3xf32, #tpu.memory_space<vmem>>, %arg13: memref<8x3xf32, #tpu.memory_space<vmem>>) attributes {dimension_semantics = [#tpu.dimension_semantics<parallel>], iteration_bounds = array<i64: 1>, scalar_prefetch = 0 : i64, scratch_operands = 0 : i64, tpu.core_type = #tpu.core_type<tc>, window_params = [{transform_indices = @transform_0, window_bounds = array<i64: 8, 2304>}, {transform_indices = @transform_1, window_bounds = array<i64: 8, 16, 64>}, {transform_indices = @transform_2, window_bounds = array<i64: 8, 16>}, {pipeline_mode = #tpu.pipeline_mode<synchronous>, transform_indices = @transform_3, window_bounds = array<i64: 2304, 256>}, {pipeline_mode = #tpu.pipeline_mode<synchronous>, transform_indices = @transform_4, window_bounds = array<i64: 1, 256>}, {pipeline_mode = #tpu.pipeline_mode<synchronous>, transform_indices = @transform_5, window_bounds = array<i64: 1, 64>}, {pipeline_mode = #tpu.pipeline_mode<synchronous>, transform_indices = @transform_6, window_bounds = array<i64: 1, 1>}, {pipeline_mode = #tpu.pipeline_mode<synchronous>, transform_indices = @transform_7, window_bounds = array<i64: 64, 256>}, {pipeline_mode = #tpu.pipeline_mode<synchronous>, transform_indices = @transform_8, window_bounds = array<i64: 1, 256>}, {pipeline_mode = #tpu.pipeline_mode<synchronous>, transform_indices = @transform_9, window_bounds = array<i64: 256, 3>}, {pipeline_mode = #tpu.pipeline_mode<synchronous>, transform_indices = @transform_10, window_bounds = array<i64: 256, 3>}, {pipeline_mode = #tpu.pipeline_mode<synchronous>, transform_indices = @transform_11, window_bounds = array<i64: 1, 3>}, {transform_indices = @transform_12, window_bounds = array<i64: 8, 3>}]} {
    %c0 = arith.constant 0 : index
    %c0_0 = arith.constant 0 : index
    %0 = vector.load %arg1[%c0, %c0_0] : memref<8x2304xbf16, #tpu.memory_space<vmem>>, vector<8x2304xbf16>
    %c0_1 = arith.constant 0 : index
    %c0_2 = arith.constant 0 : index
    %1 = vector.load %arg4[%c0_1, %c0_2] : memref<2304x256xbf16, #tpu.memory_space<vmem>>, vector<2304x256xbf16>
    %cst = arith.constant dense<0.000000e+00> : vector<8x256xf32>
    %2 = tpu.matmul %0, %1, %cst {dimension_numbers = #tpu.dot_dimension_numbers<[1], [0], [0], [1], [0, 0, 1, 1], [], []>} : vector<8x2304xbf16>, vector<2304x256xbf16>, vector<8x256xf32> -> vector<8x256xf32>
    %c0_3 = arith.constant 0 : index
    %c0_4 = arith.constant 0 : index
    %3 = vector.load %arg5[%c0_3, %c0_4] : memref<1x256xf32, #tpu.memory_space<vmem>>, vector<1x256xf32>
    %4 = vector.broadcast %3 : vector<1x256xf32> to vector<8x256xf32>
    %5 = arith.addf %2, %4 : vector<8x256xf32>
    %c0_5 = arith.constant 0 : index
    %c0_6 = arith.constant 0 : index
    %c0_7 = arith.constant 0 : index
    %6 = vector.load %arg2[%c0_5, %c0_6, %c0_7] : memref<8x16x64xbf16, #tpu.memory_space<vmem>>, vector<8x16x64xbf16>
    %7 = arith.extf %6 : vector<8x16x64xbf16> to vector<8x16x64xf32>
    %c0_8 = arith.constant 0 : index
    %c0_9 = arith.constant 0 : index
    %8 = vector.load %arg3[%c0_8, %c0_9] : memref<8x16xf32, #tpu.memory_space<vmem>>, vector<8x16xf32>
    %c0_10 = arith.constant 0 : index
    %c0_11 = arith.constant 0 : index
    %9 = vector.load %arg6[%c0_10, %c0_11] : memref<1x64xf32, #tpu.memory_space<vmem>>, vector<1x64xf32>
    %10 = vector.shape_cast %9 : vector<1x64xf32> to vector<1x1x64xf32>
    %11 = vector.broadcast %10 : vector<1x1x64xf32> to vector<8x16x64xf32>
    %12 = arith.mulf %7, %11 : vector<8x16x64xf32>
    %cst_12 = arith.constant dense<0.000000e+00> : vector<8x16xf32>
    %13 = vector.multi_reduction <add>, %12, %cst_12 [2] : vector<8x16x64xf32> to vector<8x16xf32>
    %c0_13 = arith.constant 0 : index
    %c0_14 = arith.constant 0 : index
    %14 = vector.load %arg7[%c0_13, %c0_14] : memref<1x1xf32, #tpu.memory_space<vmem>>, vector<1x1xf32>
    %15 = vector.broadcast %14 : vector<1x1xf32> to vector<8x16xf32>
    %16 = arith.addf %13, %15 : vector<8x16xf32>
    %cst_15 = arith.constant 0.000000e+00 : f32
    %17 = vector.broadcast %cst_15 : f32 to vector<8x16xf32>
    %18 = arith.cmpf ogt, %8, %17 : vector<8x16xf32>
    %cst_16 = arith.constant -1.000000e+30 : f32
    %19 = vector.broadcast %cst_16 : f32 to vector<8x16xf32>
    %20 = arith.select %18, %16, %19 : vector<8x16xi1>, vector<8x16xf32>
    %cst_17 = arith.constant dense<0xFF800000> : vector<8xf32>
    %21 = vector.multi_reduction <maximumf>, %20, %cst_17 [1] : vector<8x16xf32> to vector<8xf32>
    %22 = vector.shape_cast %21 : vector<8xf32> to vector<8x1xf32>
    %23 = vector.broadcast %22 : vector<8x1xf32> to vector<8x16xf32>
    %24 = arith.subf %20, %23 : vector<8x16xf32>
    %25 = math.exp %24 : vector<8x16xf32>
    %cst_18 = arith.constant dense<0.000000e+00> : vector<8xf32>
    %26 = vector.multi_reduction <add>, %25, %cst_18 [1] : vector<8x16xf32> to vector<8xf32>
    %27 = vector.shape_cast %26 : vector<8xf32> to vector<8x1xf32>
    %28 = vector.broadcast %27 : vector<8x1xf32> to vector<8x16xf32>
    %29 = arith.divf %25, %28 : vector<8x16xf32>
    %30 = arith.mulf %29, %8 : vector<8x16xf32>
    %31 = vector.shape_cast %30 : vector<8x16xf32> to vector<8x16x1xf32>
    %32 = vector.broadcast %31 : vector<8x16x1xf32> to vector<8x16x64xf32>
    %33 = arith.mulf %32, %7 : vector<8x16x64xf32>
    %cst_19 = arith.constant dense<0.000000e+00> : vector<8x64xf32>
    %34 = vector.multi_reduction <add>, %33, %cst_19 [1] : vector<8x16x64xf32> to vector<8x64xf32>
    %cst_20 = arith.constant dense<0.000000e+00> : vector<8xf32>
    %35 = vector.multi_reduction <add>, %30, %cst_20 [1] : vector<8x16xf32> to vector<8xf32>
    %36 = vector.shape_cast %35 : vector<8xf32> to vector<8x1xf32>
    %c0_21 = arith.constant 0 : index
    %c0_22 = arith.constant 0 : index
    %37 = vector.load %arg8[%c0_21, %c0_22] : memref<64x256xf32, #tpu.memory_space<vmem>>, vector<64x256xf32>
    %cst_23 = arith.constant dense<0.000000e+00> : vector<8x256xf32>
    %38 = tpu.matmul %34, %37, %cst_23 {dimension_numbers = #tpu.dot_dimension_numbers<[1], [0], [0], [1], [0, 0, 1, 1], [], []>} : vector<8x64xf32>, vector<64x256xf32>, vector<8x256xf32> -> vector<8x256xf32>
    %c0_24 = arith.constant 0 : index
    %c0_25 = arith.constant 0 : index
    %39 = vector.load %arg9[%c0_24, %c0_25] : memref<1x256xf32, #tpu.memory_space<vmem>>, vector<1x256xf32>
    %40 = vector.broadcast %36 : vector<8x1xf32> to vector<8x256xf32>
    %41 = vector.broadcast %39 : vector<1x256xf32> to vector<8x256xf32>
    %42 = arith.mulf %40, %41 : vector<8x256xf32>
    %43 = arith.addf %38, %42 : vector<8x256xf32>
    %c0_26 = arith.constant 0 : index
    %c0_27 = arith.constant 0 : index
    %44 = vector.load %arg10[%c0_26, %c0_27] : memref<256x3xf32, #tpu.memory_space<vmem>>, vector<256x3xf32>
    %cst_28 = arith.constant dense<0.000000e+00> : vector<8x3xf32>
    %45 = tpu.matmul %43, %44, %cst_28 {dimension_numbers = #tpu.dot_dimension_numbers<[1], [0], [0], [1], [0, 0, 1, 1], [], []>} : vector<8x256xf32>, vector<256x3xf32>, vector<8x3xf32> -> vector<8x3xf32>
    %c0_29 = arith.constant 0 : index
    %c0_30 = arith.constant 0 : index
    %46 = vector.load %arg11[%c0_29, %c0_30] : memref<256x3xf32, #tpu.memory_space<vmem>>, vector<256x3xf32>
    %cst_31 = arith.constant dense<0.000000e+00> : vector<8x3xf32>
    %47 = tpu.matmul %5, %46, %cst_31 {dimension_numbers = #tpu.dot_dimension_numbers<[1], [0], [0], [1], [0, 0, 1, 1], [], []>} : vector<8x256xf32>, vector<256x3xf32>, vector<8x3xf32> -> vector<8x3xf32>
    %48 = arith.addf %45, %47 : vector<8x3xf32>
    %c0_32 = arith.constant 0 : index
    %c0_33 = arith.constant 0 : index
    %49 = vector.load %arg12[%c0_32, %c0_33] : memref<1x3xf32, #tpu.memory_space<vmem>>, vector<1x3xf32>
    %50 = vector.broadcast %49 : vector<1x3xf32> to vector<8x3xf32>
    %51 = arith.addf %48, %50 : vector<8x3xf32>
    %c0_34 = arith.constant 0 : index
    %c0_35 = arith.constant 0 : index
    %52 = vector.load %arg13[%c0_34, %c0_35] : memref<8x3xf32, #tpu.memory_space<vmem>>, vector<8x3xf32>
    tpu.vector_store %arg13[%c0_34, %c0_35], %51 {strides = array<i32>} : memref<8x3xf32, #tpu.memory_space<vmem>>, vector<8x3xf32>,
    return
  }
  func.func @transform_0(%arg0: i32) -> (i32, i32) {
    %c0_i32 = arith.constant 0 : i32
    %c0_i32_0 = arith.constant 0 : i32
    return %arg0, %c0_i32 : i32, i32
  }
  func.func @transform_1(%arg0: i32) -> (i32, i32, i32) {
    %c0_i32 = arith.constant 0 : i32
    %c0_i32_0 = arith.constant 0 : i32
    %c0_i32_1 = arith.constant 0 : i32
    return %arg0, %c0_i32, %c0_i32_0 : i32, i32, i32
  }
  func.func @transform_2(%arg0: i32) -> (i32, i32) {
    %c0_i32 = arith.constant 0 : i32
    %c0_i32_0 = arith.constant 0 : i32
    return %arg0, %c0_i32 : i32, i32
  }
  func.func @transform_3(%arg0: i32) -> (i32, i32) {
    %c0_i32 = arith.constant 0 : i32
    %c0_i32_0 = arith.constant 0 : i32
    %c0_i32_1 = arith.constant 0 : i32
    return %c0_i32, %c0_i32_0 : i32, i32
  }
  func.func @transform_4(%arg0: i32) -> (i32, i32) {
    %c0_i32 = arith.constant 0 : i32
    %c0_i32_0 = arith.constant 0 : i32
    %c0_i32_1 = arith.constant 0 : i32
    return %c0_i32, %c0_i32_0 : i32, i32
  }
  func.func @transform_5(%arg0: i32) -> (i32, i32) {
    %c0_i32 = arith.constant 0 : i32
    %c0_i32_0 = arith.constant 0 : i32
    %c0_i32_1 = arith.constant 0 : i32
    return %c0_i32, %c0_i32_0 : i32, i32
  }
  func.func @transform_6(%arg0: i32) -> (i32, i32) {
    %c0_i32 = arith.constant 0 : i32
    %c0_i32_0 = arith.constant 0 : i32
    %c0_i32_1 = arith.constant 0 : i32
    return %c0_i32, %c0_i32_0 : i32, i32
  }
  func.func @transform_7(%arg0: i32) -> (i32, i32) {
    %c0_i32 = arith.constant 0 : i32
    %c0_i32_0 = arith.constant 0 : i32
    %c0_i32_1 = arith.constant 0 : i32
    return %c0_i32, %c0_i32_0 : i32, i32
  }
  func.func @transform_8(%arg0: i32) -> (i32, i32) {
    %c0_i32 = arith.constant 0 : i32
    %c0_i32_0 = arith.constant 0 : i32
    %c0_i32_1 = arith.constant 0 : i32
    return %c0_i32, %c0_i32_0 : i32, i32
  }
  func.func @transform_9(%arg0: i32) -> (i32, i32) {
    %c0_i32 = arith.constant 0 : i32
    %c0_i32_0 = arith.constant 0 : i32
    %c0_i32_1 = arith.constant 0 : i32
    return %c0_i32, %c0_i32_0 : i32, i32
  }
  func.func @transform_10(%arg0: i32) -> (i32, i32) {
    %c0_i32 = arith.constant 0 : i32
    %c0_i32_0 = arith.constant 0 : i32
    %c0_i32_1 = arith.constant 0 : i32
    return %c0_i32, %c0_i32_0 : i32, i32
  }
  func.func @transform_11(%arg0: i32) -> (i32, i32) {
    %c0_i32 = arith.constant 0 : i32
    %c0_i32_0 = arith.constant 0 : i32
    %c0_i32_1 = arith.constant 0 : i32
    return %c0_i32, %c0_i32_0 : i32, i32
  }
  func.func @transform_12(%arg0: i32) -> (i32, i32) {
    %c0_i32 = arith.constant 0 : i32
    %c0_i32_0 = arith.constant 0 : i32
    return %arg0, %c0_i32 : i32, i32
  }
}

</mosaic_0001>

<bundles_post_ra>
// kernel: face_attention_forward.1
= control target key start
LH: loop header
LB: loop body
LE: loop exit
PB: predicated region body
PF: predicated region fallthrough
CT: control target
= control target key end

     0   :  { %v3980_v3 = vmov 0   ;;  %vm2280_vm0 = vcmask 523264   ;;  %vm2383_vm1 = vcmask 130112   ;;  %vm2448_vm2 = vcmask 1041409   ;;  %s5543_s1 = inlined_call_operand.vmem [shape: bf16[8,16,64], index: 1, kind: input, shape index: {}]   ;;  %s5544_s5 = inlined_call_operand.vmem [shape: f32[1,64], index: 5, kind: input, shape index: {}]   ;;  %s5545_s6 = inlined_call_operand.<no memory space> [shape: f32[1,1], index: 6, kind: input, shape index: {}]   ;;  %s5546_s3 = inlined_call_operand.vmem [shape: bf16[2304,256], index: 3, kind: input, shape index: {}]   ;;  %s5547_s0 = inlined_call_operand.vmem [shape: bf16[8,2304], index: 0, kind: input, shape index: {}]   ;;  %s5548_s2 = inlined_call_operand.vmem [shape: f32[8,16], index: 2, kind: input, shape index: {}]   ;;  %s5549_s4 = inlined_call_operand.vmem [shape: f32[1,256], index: 4, kind: input, shape index: {}]   ;;  %s5550_s7 = inlined_call_operand.vmem [shape: f32[64,256], index: 7, kind: input, shape index: {}]   ;;  %s5551_s10 = inlined_call_operand.vmem [shape: f32[256,3], index: 10, kind: input, shape index: {}]   ;;  %s5552_s9 = inlined_call_operand.vmem [shape: f32[256,3], index: 9, kind: input, shape index: {}]   ;;  %s5553_s8 = inlined_call_operand.vmem [shape: f32[1,256], index: 8, kind: input, shape index: {}]   ;;  %s5554_s11 = inlined_call_operand.vmem [shape: f32[1,3], index: 11, kind: input, shape index: {}]   ;;  %s5555_s12 = inlined_call_operand.vmem [shape: f32[8,3], index: 12, kind: output, shape index: {}]  }
   0x1   :  { %v4050_v0 = vld [vmem:[%s5543_s1] sm:$0xff]   ;;  %v4060_v2 = vld [vmem:[%s5543_s1 + $0x8] sm:$0xff]   ;;  %3525 = vset.pattern.permute.xlu0 %v3980_v3  ;;  %v17_v4 = vstv %s5545_s6  ;;  %v4071_v8 = vld [vmem:[%s5543_s1 + $0x10] sm:$0xff]   ;;  %vm2450_vm3 = vcmask 1042434   ;;  %vm2452_vm4 = vcmask 1043459   ;;  %vm2454_vm5 = vcmask 1044484  }
   0x2   :  { %v4055_v1 = vld [vmem:[%s5544_s5] ss:$0 sm:$0xff]  ;;  %v3304_v5 = vunpack.c.l.bf16 %v4050_v0  ;;  %v3305_v6 = vunpack.c.h.bf16 %v4050_v0  ;;  %v3308_v7 = vunpack.c.l.bf16 %v4060_v2  ;;  %v3309_v9 = vunpack.c.h.bf16 %v4060_v2  ;;  %18 = vst [vmem:[#allocation2] sm:$0x1] %v17_v4  ;;  %v4078_v11 = vld [vmem:[%s5543_s1 + $0x18] sm:$0xff]   ;;  %v4132_v33 = vld [vmem:[%s5543_s1 + $0x28] sm:$0xff]  }
   0x3   :  { %v3312_v10 = vunpack.c.l.bf16 %v4071_v8  ;;  %v3313_v12 = vunpack.c.h.bf16 %v4071_v8  ;;  %v3526_v17 = vld [vmem:[%s5546_s3 + $0x404] ss:$8 sps:$4 sm:$0xff]   ;;  %v3528_v18 = vld [vmem:[%s5546_s3 + $0x400] ss:$8 sps:$4 sm:$0xff]   ;;  %v3529_v21 = vld [vmem:[%s5546_s3 + $0x414] ss:$8 sps:$4 sm:$0xff]   ;;  %v3316_v23 = vunpack.c.l.bf16 %v4078_v11  ;;  %v3317_v28 = vunpack.c.h.bf16 %v4078_v11 }
   0x4   :  { %v2264_v13 = vmul.f32 %v3304_v5, %v4055_v1  ;;  %v2265_v14 = vmul.f32 %v3305_v6, %v4055_v1  ;;  %v2266_v15 = vmul.f32 %v3308_v7, %v4055_v1  ;;  %v2267_v16 = vmul.f32 %v3309_v9, %v4055_v1  ;;  %2019 = vmatprep.subr.bf16.mxu0 %v3526_v17  ;;  %v4111_v24 = vld [vmem:[%s5543_s1 + $0x20] sm:$0xff]   ;;  %v3531_v29 = vld [vmem:[%s5546_s3 + $0x410] ss:$8 sps:$4 sm:$0xff]   ;;  %v3535_v39 = vld [vmem:[%s5546_s3 + $0x434] ss:$8 sps:$4 sm:$0xff]  }
   0x5   :  { %v2268_v22 = vmul.f32 %v3312_v10, %v4055_v1  ;;  %v2269_v27 = vmul.f32 %v3313_v12, %v4055_v1  ;;  %2020 = vmatpush1.bf16.msra.mxu0 %v3528_v18  ;;  %v3532_v30 = vld [vmem:[%s5546_s3 + $0x424] ss:$8 sps:$4 sm:$0xff]   ;;  %v2270_v31 = vmul.f32 %v3316_v23, %v4055_v1  ;;  %v3320_v32 = vunpack.c.l.bf16 %v4111_v24  ;;  %v3534_v38 = vld [vmem:[%s5546_s3 + $0x420] ss:$8 sps:$4 sm:$0xff]   ;;  %v4158_v45 = vld [vmem:[%s5543_s1 + $0x30] sm:$0xff]  }
   0x6   :  { %v2281_v19 = vsel %vm2280_vm0, %v2264_v13, 0.0  ;;  %v2287_v20 = vsel %vm2280_vm0, %v2266_v15, 0.0  ;;  %v2284_v25 = vsel %vm2280_vm0, %v2265_v14, 0.0  ;;  %v2290_v26 = vsel %vm2280_vm0, %v2267_v16, 0.0  ;;  %2021 = vmatprep.subr.bf16.mxu0 %v3529_v21  ;;  %v3537_v47 = vld [vmem:[%s5546_s3 + $0x430] ss:$8 sps:$4 sm:$0xff]  }
   0x7   :  { %2282 = vadd.xlane.f32.xlu0 %v2281_v19  ;;  %2288 = vadd.xlane.f32.xlu1 %v2287_v20  ;;  %v2293_v34 = vsel %vm2280_vm0, %v2268_v22, 0.0  ;;  %v2296_v35 = vsel %vm2280_vm0, %v2269_v27, 0.0  ;;  %v2271_v36 = vmul.f32 %v3317_v28, %v4055_v1  ;;  %v3321_v37 = vunpack.c.h.bf16 %v4111_v24  ;;  %v3538_v48 = vld [vmem:[%s5546_s3 + $0x444] ss:$8 sps:$4 sm:$0xff]   ;;  %v4179_v54 = vld [vmem:[%s5543_s1 + $0x38] sm:$0xff]  }
   0x8   :  { %v2299_v40 = vsel %vm2280_vm0, %v2270_v31, 0.0  ;;  %v2272_v41 = vmul.f32 %v3320_v32, %v4055_v1  ;;  %v3324_v43 = vunpack.c.l.bf16 %v4132_v33  ;;  %v3325_v46 = vunpack.c.h.bf16 %v4132_v33  ;;  %v3540_v56 = vld [vmem:[%s5546_s3 + $0x440] ss:$8 sps:$4 sm:$0xff]   ;;  %v3541_v57 = vld [vmem:[%s5546_s3 + $0x454] ss:$8 sps:$4 sm:$0xff]  }
   0x9   :  { %2022 = vmatpush1.bf16.msra.mxu0 %v3531_v29  ;;  %v2302_v42 = vsel %vm2280_vm0, %v2271_v36, 0.0  ;;  %v2273_v44 = vmul.f32 %v3321_v37, %v4055_v1  ;;  %v3328_v50 = vunpack.c.l.bf16 %v4158_v45  ;;  %v3329_v55 = vunpack.c.h.bf16 %v4158_v45  ;;  %v3543_v3 = vld [vmem:[%s5546_s3 + $0x450] ss:$8 sps:$4 sm:$0xff]   ;;  %v3544_v4 = vld [vmem:[%s5546_s3 + $0x464] ss:$8 sps:$4 sm:$0xff]  }
   0xa   :  { %2023 = vmatprep.subr.bf16.mxu0 %v3532_v30  ;;  %v2305_v49 = vsel %vm2280_vm0, %v2272_v41, 0.0  ;;  %v2274_v51 = vmul.f32 %v3324_v43, %v4055_v1  ;;  %v2275_v53 = vmul.f32 %v3325_v46, %v4055_v1  ;;  %v3332_v58 = vunpack.c.l.bf16 %v4179_v54  ;;  %v3546_v14 = vld [vmem:[%s5546_s3 + $0x460] ss:$8 sps:$4 sm:$0xff]   ;;  %v3574_v18 = vld [vmem:[%s5546_s3 + $0x4] ss:$8 sps:$4 sm:$0xff]  }
   0xb   :  { %2285 = vadd.xlane.f32.xlu0 %v2284_v25  ;;  %2291 = vadd.xlane.f32.xlu1 %v2290_v26  ;;  %v2308_v52 = vsel %vm2280_vm0, %v2273_v44, 0.0  ;;  %v3333_v59 = vunpack.c.h.bf16 %v4179_v54  ;;  %v2276_v61 = vmul.f32 %v3328_v50, %v4055_v1  ;;  %v2277_v63 = vmul.f32 %v3329_v55, %v4055_v1  ;;  %v4221_v19 = vld [vmem:[%s5547_s0 + $0x20] sm:$0xff]  ;;  %v3547_v20 = vld [vmem:[%s5546_s3 + $0x474] ss:$8 sps:$4 sm:$0xff]   ;;  %v3549_v27 = vld [vmem:[%s5546_s3 + $0x470] ss:$8 sps:$4 sm:$0xff]  }
   0xc   :  { %v2311_v60 = vsel %vm2280_vm0, %v2274_v51, 0.0  ;;  %v2314_v62 = vsel %vm2280_vm0, %v2275_v53, 0.0  ;;  %v2278_v13 = vmul.f32 %v3332_v58, %v4055_v1  ;;  %v3001_v21 = vcombine.high %v4221_v19, %v4221_v19  ;;  %1855 = vmatprep.subr.bf16.mxu1 %v3574_v18  ;;  %v3582_v25 = vld [vmem:[%s5546_s3 + $0x14] ss:$8 sps:$4 sm:$0xff]   ;;  %v3550_v29 = vld [vmem:[%s5546_s3 + $0x484] ss:$8 sps:$4 sm:$0xff]  }
   0xd   :  { %2024 = vmatpush1.bf16.msra.mxu0 %v3534_v38  ;;  %v2317_v15 = vsel %vm2280_vm0, %v2276_v61, 0.0  ;;  %v2320_v16 = vsel %vm2280_vm0, %v2277_v63, 0.0  ;;  %v2279_v17 = vmul.f32 %v3333_v59, %v4055_v1  ;;  %v3581_v1 = vld [vmem:[%s5546_s3] ss:$8 sps:$4 sm:$0xff]   ;;  %v3587_v30 = vld [vmem:[%s5546_s3 + $0x10] ss:$8 sps:$4 sm:$0xff]  }
   0xe   :  { %2025 = vmatprep.subr.bf16.mxu0 %v3535_v39  ;;  %v2323_v22 = vsel %vm2280_vm0, %v2278_v13, 0.0  ;;  %2051 = vmatprep.mubr.bf16.mxu0 %v3001_v21  ;;  %v3588_v31 = vld [vmem:[%s5546_s3 + $0x24] ss:$8 sps:$4 sm:$0xff]   ;;  %v3593_v36 = vld [vmem:[%s5546_s3 + $0x20] ss:$8 sps:$4 sm:$0xff]   ;;  %vm2456_vm6 = vcmask 1045509  }
   0xf   :  { %2294 = vadd.xlane.f32.xlu0 %v2293_v34  ;;  %2297 = vadd.xlane.f32.xlu1 %v2296_v35  ;;  %v2326_v26 = vsel %vm2280_vm0, %v2279_v17, 0.0  ;;  %v3552_v34 = vld [vmem:[%s5546_s3 + $0x480] ss:$8 sps:$4 sm:$0xff]   ;;  %v3553_v35 = vld [vmem:[%s5546_s3 + $0x494] ss:$8 sps:$4 sm:$0xff]   ;;  %vm2458_vm7 = vcmask 1046534  }
  0x10   :  { %1856 = vmatpush1.bf16.msra.mxu1 %v3581_v1  ;;  %v3594_v38 = vld [vmem:[%s5546_s3 + $0x34] ss:$8 sps:$4 sm:$0xff]   ;;  %v3555_v39 = vld [vmem:[%s5546_s3 + $0x490] ss:$8 sps:$4 sm:$0xff]   ;;  %v3558_v44 = vld [vmem:[%s5546_s3 + $0x4a0] ss:$8 sps:$4 sm:$0xff]  }
  0x11   :  { %2026 = vmatpush1.bf16.msra.mxu0 %v3537_v47  ;;  %1857 = vmatprep.subr.bf16.mxu1 %v3582_v25  ;;  %v3599_v41 = vld [vmem:[%s5546_s3 + $0x30] ss:$8 sps:$4 sm:$0xff]   ;;  %v3559_v47 = vld [vmem:[%s5546_s3 + $0x4b4] ss:$8 sps:$4 sm:$0xff]   ;;  %v3299_v61 = vld [vmem:[#allocation2] ss:$0 sm:$0xff] }
  0x12   :  { %2027 = vmatprep.subr.bf16.mxu0 %v3538_v48  ;;  %v3605_v48 = vld [vmem:[%s5546_s3 + $0x40] ss:$8 sps:$4 sm:$0xff]   ;;  %v3561_v51 = vld [vmem:[%s5546_s3 + $0x4b0] ss:$8 sps:$4 sm:$0xff]   ;;  %v3618_v63 = vld [vmem:[%s5546_s3 + $0x74] ss:$8 sps:$4 sm:$0xff]  }
  0x13   :  { %2300 = vadd.xlane.f32.xlu0 %v2299_v40  ;;  %2303 = vadd.xlane.f32.xlu1 %v2302_v42  ;;  %v3556_v40 = vld [vmem:[%s5546_s3 + $0x4a4] ss:$8 sps:$4 sm:$0xff]   ;;  %v3611_v53 = vld [vmem:[%s5546_s3 + $0x50] ss:$8 sps:$4 sm:$0xff]   ;;  %v3629_v17 = vld [vmem:[%s5546_s3 + $0x80] ss:$8 sps:$4 sm:$0xff]  }
  0x14   :  { %1858 = vmatpush1.bf16.msra.mxu1 %v3587_v30  ;;  %v3600_v42 = vld [vmem:[%s5546_s3 + $0x44] ss:$8 sps:$4 sm:$0xff]   ;;  %v3623_v13 = vld [vmem:[%s5546_s3 + $0x70] ss:$8 sps:$4 sm:$0xff]   ;;  %v3630_v18 = vld [vmem:[%s5546_s3 + $0x94] ss:$8 sps:$4 sm:$0xff]  }
  0x15   :  { %2028 = vmatpush1.bf16.msra.mxu0 %v3540_v56  ;;  %1859 = vmatprep.subr.bf16.mxu1 %v3588_v31  ;;  %v3612_v56 = vld [vmem:[%s5546_s3 + $0x64] ss:$8 sps:$4 sm:$0xff]   ;;  %v3635_v1 = vld [vmem:[%s5546_s3 + $0x90] ss:$8 sps:$4 sm:$0xff]   ;;  %v3578_v25 = vld [vmem:[%s5546_s3 + $0x500] ss:$8 sps:$4 sm:$0xff]  }
  0x16   :  { %2029 = vmatprep.subr.bf16.mxu0 %v3541_v57  ;;  %v3564_v57 = vld [vmem:[%s5546_s3 + $0x4c0] ss:$8 sps:$4 sm:$0xff]   ;;  %v3580_v21 = vld [vmem:[%s5546_s3 + $0x504] ss:$8 sps:$4 sm:$0xff]   ;;  %v3642_v30 = vld [vmem:[%s5546_s3 + $0xb4] ss:$8 sps:$4 sm:$0xff]  }
  0x17   :  { %2306 = vadd.xlane.f32.xlu0 %v2305_v49  ;;  %2309 = vadd.xlane.f32.xlu1 %v2308_v52  ;;  %v3606_v49 = vld [vmem:[%s5546_s3 + $0x54] ss:$8 sps:$4 sm:$0xff]   ;;  %v3562_v52 = vld [vmem:[%s5546_s3 + $0x4c4] ss:$8 sps:$4 sm:$0xff]   ;;  %v3584_v31 = vld [vmem:[%s5546_s3 + $0x510] ss:$8 sps:$4 sm:$0xff]  }
  0x18   :  { %1860 = vmatpush1.bf16.msra.mxu1 %v3593_v36  ;;  %v3590_v36 = vld [vmem:[%s5546_s3 + $0x520] ss:$8 sps:$4 sm:$0xff]   ;;  %vm2460_vm8 = vcmask 1047559   ;;  %vm2464_vm10 = vcmask 130048   ;;  %vm2986_vm11 = vcmask 23552  }
  0x19   :  { %2030 = vmatpush1.bf16.msra.mxu0 %v3543_v3  ;;  %1861 = vmatprep.subr.bf16.mxu1 %v3594_v38  ;;  %v3567_v3 = vld [vmem:[%s5546_s3 + $0x4d0] ss:$8 sps:$4 sm:$0xff]   ;;  %v3598_v38 = vld [vmem:[%s5546_s3 + $0x534] ss:$8 sps:$4 sm:$0xff]  }
  0x1a   :  { %2031 = vmatprep.subr.bf16.mxu0 %v3544_v4  ;;  %v3568_v4 = vld [vmem:[%s5546_s3 + $0x4e4] ss:$8 sps:$4 sm:$0xff]  }
  0x1b   :  { %2312 = vadd.xlane.f32.xlu0 %v2311_v60  ;;  %2315 = vadd.xlane.f32.xlu1 %v2314_v62  ;;  %v3565_v60 = vld [vmem:[%s5546_s3 + $0x4d4] ss:$8 sps:$4 sm:$0xff]   ;;  %v3617_v62 = vld [vmem:[%s5546_s3 + $0x60] ss:$8 sps:$4 sm:$0xff]  }
  0x1c   :  { %1862 = vmatpush1.bf16.msra.mxu1 %v3599_v41 }
  0x1d   :  { %2032 = vmatpush1.bf16.msra.mxu0 %v3546_v14  ;;  %1863 = vmatprep.subr.bf16.mxu1 %v3600_v42  ;;  %v3624_v14 = vld [vmem:[%s5546_s3 + $0x84] ss:$8 sps:$4 sm:$0xff]  }
  0x1e   :  { %2033 = vmatprep.subr.bf16.mxu0 %v3547_v20  ;;  %v3573_v20 = vld [vmem:[%s5546_s3 + $0x4f0] ss:$8 sps:$4 sm:$0xff]   ;;  %v4385_v42 = vld [vmem:[%s5547_s0 + $0x28] sm:$0xff] }
  0x1f   :  { %2318 = vadd.xlane.f32.xlu0 %v2317_v15  ;;  %2321 = vadd.xlane.f32.xlu1 %v2320_v16  ;;  %v3570_v15 = vld [vmem:[%s5546_s3 + $0x4e0] ss:$8 sps:$4 sm:$0xff]   ;;  %v3571_v16 = vld [vmem:[%s5546_s3 + $0x4f4] ss:$8 sps:$4 sm:$0xff]  }
  0x20   :  { %1864 = vmatpush1.bf16.msra.mxu1 %v3605_v48  ;;  %v3596_v48 = vld [vmem:[%s5546_s3 + $0x530] ss:$8 sps:$4 sm:$0xff]  }
  0x21   :  { %2034 = vmatpush1.bf16.msra.mxu0 %v3549_v27  ;;  %1865 = vmatprep.subr.bf16.mxu1 %v3606_v49  ;;  %v3586_v27 = vld [vmem:[%s5546_s3 + $0x514] ss:$8 sps:$4 sm:$0xff]   ;;  %v3604_v49 = vld [vmem:[%s5546_s3 + $0x544] ss:$8 sps:$4 sm:$0xff]  }
  0x22   :  { %2035 = vmatprep.subr.bf16.mxu0 %v3550_v29  ;;  %v3641_v29 = vld [vmem:[%s5546_s3 + $0xa0] ss:$8 sps:$4 sm:$0xff]  }
  0x23   :  { %2324 = vadd.xlane.f32.xlu0 %v2323_v22  ;;  %2327 = vadd.xlane.f32.xlu1 %v2326_v26  ;;  %v3636_v22 = vld [vmem:[%s5546_s3 + $0xa4] ss:$8 sps:$4 sm:$0xff]   ;;  %v3000_v26 = vcombine.low %v4221_v19, %v4221_v19 }
  0x24   :  { %1866 = vmatpush1.bf16.msra.mxu1 %v3611_v53  ;;  %v3592_v19 = vld [vmem:[%s5546_s3 + $0x524] ss:$8 sps:$4 sm:$0xff]   ;;  %v3602_v53 = vld [vmem:[%s5546_s3 + $0x540] ss:$8 sps:$4 sm:$0xff]  }
  0x25   :  { %2036 = vmatpush1.bf16.msra.mxu0 %v3552_v34  ;;  %1867 = vmatprep.subr.bf16.mxu1 %v3612_v56  ;;  %v3647_v34 = vld [vmem:[%s5546_s3 + $0xb0] ss:$8 sps:$4 sm:$0xff]   ;;  %v3610_v56 = vld [vmem:[%s5546_s3 + $0x554] ss:$8 sps:$4 sm:$0xff]  }
  0x26   :  { %2037 = vmatprep.subr.bf16.mxu0 %v3553_v35  ;;  %v3648_v35 = vld [vmem:[%s5546_s3 + $0xc4] ss:$8 sps:$4 sm:$0xff]  }
  0x28   :  { %1868 = vmatpush1.bf16.msra.mxu1 %v3617_v62  ;;  %v3616_v62 = vld [vmem:[%s5546_s3 + $0x564] ss:$8 sps:$4 sm:$0xff]  }
  0x29   :  { %2038 = vmatpush1.bf16.msra.mxu0 %v3555_v39  ;;  %1869 = vmatprep.subr.bf16.mxu1 %v3618_v63  ;;  %v43_v39 = vld [vmem:[%s5547_s0] sm:$0xff]  ;;  %v3671_v63 = vld [vmem:[%s5546_s3 + $0xf0] ss:$8 sps:$4 sm:$0xff]  }
  0x2a   :  { %2039 = vmatprep.subr.bf16.mxu0 %v3556_v40  ;;  %v3653_v40 = vld [vmem:[%s5546_s3 + $0xc0] ss:$8 sps:$4 sm:$0xff]   ;;  %v2993_v41 = vcombine.high %v43_v39, %v43_v39 }
  0x2c   :  { %1870 = vmatpush1.bf16.msra.mxu1 %v3623_v13  ;;  %1887 = vmatprep.mubr.bf16.mxu1 %v2993_v41  ;;  %v3622_v13 = vld [vmem:[%s5546_s3 + $0x574] ss:$8 sps:$4 sm:$0xff]   ;;  %v4500_v41 = vld [vmem:[%s5547_s0 + $0x8] sm:$0xff] }
  0x2d   :  { %2040 = vmatpush1.bf16.msra.mxu0 %v3558_v44  ;;  %1871 = vmatprep.subr.bf16.mxu1 %v3624_v14  ;;  %v3654_v44 = vld [vmem:[%s5546_s3 + $0xd4] ss:$8 sps:$4 sm:$0xff]   ;;  %v2992_v14 = vcombine.low %v43_v39, %v43_v39  ;;  %v3652_v39 = vld [vmem:[%s5546_s3 + $0x5c4] ss:$8 sps:$4 sm:$0xff]  }
  0x2e   :  { %2041 = vmatprep.subr.bf16.mxu0 %v3559_v47  ;;  %v3003_v47 = vcombine.high %v4385_v42, %v4385_v42 }
  0x30   :  { %1872 = vmatpush1.bf16.msra.mxu1 %v3629_v17  ;;  %v3620_v17 = vld [vmem:[%s5546_s3 + $0x570] ss:$8 sps:$4 sm:$0xff]  }
  0x31   :  { %2042 = vmatpush1.bf16.msra.mxu0 %v3561_v51  ;;  %1873 = vmatprep.subr.bf16.mxu1 %v3630_v18  ;;  %v3659_v51 = vld [vmem:[%s5546_s3 + $0xd0] ss:$8 sps:$4 sm:$0xff]   ;;  %v3628_v18 = vld [vmem:[%s5546_s3 + $0x584] ss:$8 sps:$4 sm:$0xff]  }
  0x32   :  { %2043 = vmatprep.subr.bf16.mxu0 %v3562_v52  ;;  %v3660_v52 = vld [vmem:[%s5546_s3 + $0xe4] ss:$8 sps:$4 sm:$0xff]  }
  0x34   :  { %1874 = vmatpush1.bf16.msra.mxu1 %v3635_v1  ;;  %v3626_v1 = vld [vmem:[%s5546_s3 + $0x580] ss:$8 sps:$4 sm:$0xff]  }
  0x35   :  { %2044 = vmatpush1.bf16.msra.mxu0 %v3564_v57  ;;  %1875 = vmatprep.subr.bf16.mxu1 %v3636_v22  ;;  %v3665_v57 = vld [vmem:[%s5546_s3 + $0xe0] ss:$8 sps:$4 sm:$0xff]   ;;  %v3634_v22 = vld [vmem:[%s5546_s3 + $0x594] ss:$8 sps:$4 sm:$0xff]  }
  0x36   :  { %2045 = vmatprep.subr.bf16.mxu0 %v3565_v60  ;;  %v3666_v60 = vld [vmem:[%s5546_s3 + $0xf4] ss:$8 sps:$4 sm:$0xff]  }
  0x38   :  { %1876 = vmatpush1.bf16.msra.mxu1 %v3641_v29  ;;  %v3640_v29 = vld [vmem:[%s5546_s3 + $0x5a4] ss:$8 sps:$4 sm:$0xff]  }
  0x39   :  { %2336 = vperm.xlu0 %3525, %v3299_v61   ;;  %2046 = vmatpush1.bf16.msra.mxu0 %v3567_v3  ;;  %v3608_v61 = vld [vmem:[%s5546_s3 + $0x550] ss:$8 sps:$4 sm:$0xff]   ;;  %v3676_v3 = vld [vmem:[%s5546_s3 + $0x104] ss:$8 sps:$4 sm:$0xff]  }
  0x3a   :  { %2047 = vmatprep.subr.bf16.mxu0 %v3568_v4  ;;  %1877 = vmatprep.subr.bf16.mxu1 %v3642_v30  ;;  %v3614_v4 = vld [vmem:[%s5546_s3 + $0x560] ss:$8 sps:$4 sm:$0xff]   ;;  %v3694_v30 = vld [vmem:[%s5546_s3 + $0x130] ss:$8 sps:$4 sm:$0xff]  }
  0x3c   :  { %1878 = vmatpush1.bf16.msra.mxu1 %v3647_v34  ;;  %v3646_v34 = vld [vmem:[%s5546_s3 + $0x5b4] ss:$8 sps:$4 sm:$0xff]  }
  0x3d   :  { %2048 = vmatpush1.bf16.msra.mxu0 %v3570_v15  ;;  %1879 = vmatprep.subr.bf16.mxu1 %v3648_v35  ;;  %v3674_v15 = vld [vmem:[%s5546_s3 + $0x100] ss:$8 sps:$4 sm:$0xff]  }
  0x3e   :  { %2049 = vmatprep.subr.bf16.mxu0 %v3571_v16  ;;  %v3684_v16 = vld [vmem:[%s5546_s3 + $0x114] ss:$8 sps:$4 sm:$0xff]   ;;  %v3700_v35 = vld [vmem:[%s5546_s3 + $0x140] ss:$8 sps:$4 sm:$0xff]  }
  0x40   :  { %1880 = vmatpush1.bf16.msra.mxu1 %v3653_v40  ;;  %v3706_v40 = vld [vmem:[%s5546_s3 + $0x150] ss:$8 sps:$4 sm:$0xff]  }
  0x41   :  { %2050 = vmatpush1.bf16.msra.mxu0 %v3573_v20  ;;  %1881 = vmatprep.subr.bf16.mxu1 %v3654_v44  ;;  %v3682_v20 = vld [vmem:[%s5546_s3 + $0x110] ss:$8 sps:$4 sm:$0xff]   ;;  %v3714_v44 = vld [vmem:[%s5546_s3 + $0x164] ss:$8 sps:$4 sm:$0xff]  }
  0x42   :  { %2060 = vmatprep.subr.bf16.mxu0 %v3580_v21  ;;  %v3690_v21 = vld [vmem:[%s5546_s3 + $0x124] ss:$8 sps:$4 sm:$0xff]  }
  0x44   :  { %2052 = vmatmul.mubr.bf16.vlgmr.msra.gmra.mrb[0].mxu0 %v3000_v26  ;;  %1882 = vmatpush1.bf16.msra.mxu1 %v3659_v51  ;;  %v3696_v26 = vld [vmem:[%s5546_s3 + $0x134] ss:$8 sps:$4 sm:$0xff]   ;;  %v3712_v51 = vld [vmem:[%s5546_s3 + $0x160] ss:$8 sps:$4 sm:$0xff]  }
  0x45   :  { %2061 = vmatpush1.bf16.msra.mxu0 %v3578_v25  ;;  %2092 = vmatprep.mubr.bf16.mxu0 %v3003_v47  ;;  %v3688_v25 = vld [vmem:[%s5546_s3 + $0x120] ss:$8 sps:$4 sm:$0xff]   ;;  %v2995_v47 = vcombine.high %v4500_v41, %v4500_v41 }
  0x46   :  { %2062 = vmatprep.subr.bf16.mxu0 %v3586_v27  ;;  %1883 = vmatprep.subr.bf16.mxu1 %v3660_v52  ;;  %v3632_v27 = vld [vmem:[%s5546_s3 + $0x590] ss:$8 sps:$4 sm:$0xff]   ;;  %v3720_v52 = vld [vmem:[%s5546_s3 + $0x174] ss:$8 sps:$4 sm:$0xff]  }
  0x48   :  { %1884 = vmatpush1.bf16.msra.mxu1 %v3665_v57  ;;  %v3718_v57 = vld [vmem:[%s5546_s3 + $0x170] ss:$8 sps:$4 sm:$0xff]  }
  0x49   :  { %2063 = vmatpush1.bf16.msra.mxu0 %v3584_v31  ;;  %1885 = vmatprep.subr.bf16.mxu1 %v3666_v60  ;;  %v3702_v31 = vld [vmem:[%s5546_s3 + $0x144] ss:$8 sps:$4 sm:$0xff]  }
  0x4a   :  { %2064 = vmatprep.subr.bf16.mxu0 %v3592_v19  ;;  %v3638_v19 = vld [vmem:[%s5546_s3 + $0x5a0] ss:$8 sps:$4 sm:$0xff]   ;;  %v3726_v60 = vld [vmem:[%s5546_s3 + $0x184] ss:$8 sps:$4 sm:$0xff]  }
  0x4c   :  { %1886 = vmatpush1.bf16.msra.mxu1 %v3671_v63  ;;  %v3724_v63 = vld [vmem:[%s5546_s3 + $0x180] ss:$8 sps:$4 sm:$0xff]  }
  0x4d   :  { %2065 = vmatpush1.bf16.msra.mxu0 %v3590_v36  ;;  %1896 = vmatprep.subr.bf16.mxu1 %v3676_v3  ;;  %v3708_v36 = vld [vmem:[%s5546_s3 + $0x154] ss:$8 sps:$4 sm:$0xff]  }
  0x4e   :  { %2066 = vmatprep.subr.bf16.mxu0 %v3598_v38  ;;  %v3644_v38 = vld [vmem:[%s5546_s3 + $0x5b0] ss:$8 sps:$4 sm:$0xff]   ;;  %v3732_v3 = vld [vmem:[%s5546_s3 + $0x194] ss:$8 sps:$4 sm:$0xff]  }
  0x4f   :  { %1888 = vmatmul.mubr.bf16.vlgmr.msra.gmra.mrb[0].mxu1 %v2992_v14  ;;  %v4552_v14 = vld [vmem:[%s5547_s0 + $0x30] sm:$0xff] }
  0x50   :  { %1897 = vmatpush1.bf16.msra.mxu1 %v3674_v15  ;;  %1928 = vmatprep.mubr.bf16.mxu1 %v2995_v47  ;;  %v3730_v15 = vld [vmem:[%s5546_s3 + $0x190] ss:$8 sps:$4 sm:$0xff]   ;;  %v3711_v47 = vld [vmem:[%s5546_s3 + $0x654] ss:$8 sps:$4 sm:$0xff]  }
  0x51   :  { %2067 = vmatpush1.bf16.msra.mxu0 %v3596_v48  ;;  %1898 = vmatprep.subr.bf16.mxu1 %v3684_v16  ;;  %v3650_v48 = vld [vmem:[%s5546_s3 + $0x5c0] ss:$8 sps:$4 sm:$0xff]   ;;  %v3002_v16 = vcombine.low %v4385_v42, %v4385_v42 }
  0x52   :  { %2068 = vmatprep.subr.bf16.mxu0 %v3604_v49  ;;  %v3658_v49 = vld [vmem:[%s5546_s3 + $0x5d4] ss:$8 sps:$4 sm:$0xff]   ;;  %v3736_v42 = vld [vmem:[%s5546_s3 + $0x1a0] ss:$8 sps:$4 sm:$0xff]  }
  0x54   :  { %1899 = vmatpush1.bf16.msra.mxu1 %v3682_v20  ;;  %v3005_v20 = vcombine.high %v4552_v14, %v4552_v14 }
  0x55   :  { %2069 = vmatpush1.bf16.msra.mxu0 %v3602_v53  ;;  %1900 = vmatprep.subr.bf16.mxu1 %v3690_v21  ;;  %v3656_v53 = vld [vmem:[%s5546_s3 + $0x5d0] ss:$8 sps:$4 sm:$0xff]   ;;  %v3687_v21 = vld [vmem:[%s5546_s3 + $0x614] ss:$8 sps:$4 sm:$0xff]  }
  0x56   :  { %2070 = vmatprep.subr.bf16.mxu0 %v3610_v56  ;;  %v3664_v56 = vld [vmem:[%s5546_s3 + $0x5e4] ss:$8 sps:$4 sm:$0xff]  }
  0x58   :  { %1901 = vmatpush1.bf16.msra.mxu1 %v3688_v25  ;;  %v3693_v25 = vld [vmem:[%s5546_s3 + $0x624] ss:$8 sps:$4 sm:$0xff]  }
  0x59   :  { %2071 = vmatpush1.bf16.msra.mxu0 %v3608_v61  ;;  %1902 = vmatprep.subr.bf16.mxu1 %v3696_v26  ;;  %v3662_v61 = vld [vmem:[%s5546_s3 + $0x5e0] ss:$8 sps:$4 sm:$0xff]   ;;  %v3742_v26 = vld [vmem:[%s5546_s3 + $0x1b0] ss:$8 sps:$4 sm:$0xff]  }
  0x5a   :  { %2072 = vmatprep.subr.bf16.mxu0 %v3616_v62  ;;  %v3670_v62 = vld [vmem:[%s5546_s3 + $0x5f4] ss:$8 sps:$4 sm:$0xff]  }
  0x5c   :  { %1903 = vmatpush1.bf16.msra.mxu1 %v3694_v30  ;;  %v3699_v30 = vld [vmem:[%s5546_s3 + $0x634] ss:$8 sps:$4 sm:$0xff]  }
  0x5d   :  { %2073 = vmatpush1.bf16.msra.mxu0 %v3614_v4  ;;  %1904 = vmatprep.subr.bf16.mxu1 %v3702_v31  ;;  %v3668_v4 = vld [vmem:[%s5546_s3 + $0x5f0] ss:$8 sps:$4 sm:$0xff]   ;;  %v3748_v31 = vld [vmem:[%s5546_s3 + $0x1c0] ss:$8 sps:$4 sm:$0xff]  }
  0x5e   :  { %2074 = vmatprep.subr.bf16.mxu0 %v3622_v13  ;;  %v3681_v13 = vld [vmem:[%s5546_s3 + $0x604] ss:$8 sps:$4 sm:$0xff]  }
  0x60   :  { %1905 = vmatpush1.bf16.msra.mxu1 %v3700_v35  ;;  %v3705_v35 = vld [vmem:[%s5546_s3 + $0x644] ss:$8 sps:$4 sm:$0xff]  }
  0x61   :  { %2075 = vmatpush1.bf16.msra.mxu0 %v3620_v17  ;;  %1906 = vmatprep.subr.bf16.mxu1 %v3708_v36  ;;  %v3738_v17 = vld [vmem:[%s5546_s3 + $0x1a4] ss:$8 sps:$4 sm:$0xff]   ;;  %v3754_v36 = vld [vmem:[%s5546_s3 + $0x1d0] ss:$8 sps:$4 sm:$0xff]  }
  0x62   :  { %2076 = vmatprep.subr.bf16.mxu0 %v3628_v18  ;;  %v3679_v18 = vld [vmem:[%s5546_s3 + $0x600] ss:$8 sps:$4 sm:$0xff]  }
  0x64   :  { %1907 = vmatpush1.bf16.msra.mxu1 %v3706_v40 }
  0x65   :  { %2077 = vmatpush1.bf16.msra.mxu0 %v3626_v1  ;;  %1908 = vmatprep.subr.bf16.mxu1 %v3714_v44  ;;  %v3744_v1 = vld [vmem:[%s5546_s3 + $0x1b4] ss:$8 sps:$4 sm:$0xff]   ;;  %v3703_v44 = vld [vmem:[%s5546_s3 + $0x640] ss:$8 sps:$4 sm:$0xff]  }
  0x66   :  { %2078 = vmatprep.subr.bf16.mxu0 %v3634_v22  ;;  %v3685_v22 = vld [vmem:[%s5546_s3 + $0x610] ss:$8 sps:$4 sm:$0xff]  }
  0x68   :  { %1909 = vmatpush1.bf16.msra.mxu1 %v3712_v51 }
  0x69   :  { %2079 = vmatpush1.bf16.msra.mxu0 %v3632_v27  ;;  %1910 = vmatprep.subr.bf16.mxu1 %v3720_v52  ;;  %v3750_v27 = vld [vmem:[%s5546_s3 + $0x1c4] ss:$8 sps:$4 sm:$0xff]  }
  0x6a   :  { %2080 = vmatprep.subr.bf16.mxu0 %v3640_v29  ;;  %v3691_v29 = vld [vmem:[%s5546_s3 + $0x620] ss:$8 sps:$4 sm:$0xff]  }
  0x6c   :  { %1911 = vmatpush1.bf16.msra.mxu1 %v3718_v57  ;;  %v3766_v57 = vld [vmem:[%s5546_s3 + $0x1f0] ss:$8 sps:$4 sm:$0xff]  }
  0x6d   :  { %2081 = vmatpush1.bf16.msra.mxu0 %v3638_v19  ;;  %1912 = vmatprep.subr.bf16.mxu1 %v3726_v60  ;;  %v3756_v19 = vld [vmem:[%s5546_s3 + $0x1d4] ss:$8 sps:$4 sm:$0xff]   ;;  %v3776_v60 = vld [vmem:[%s5546_s3 + $0x204] ss:$8 sps:$4 sm:$0xff]  }
  0x6e   :  { %2082 = vmatprep.subr.bf16.mxu0 %v3646_v34  ;;  %v3697_v34 = vld [vmem:[%s5546_s3 + $0x630] ss:$8 sps:$4 sm:$0xff]  }
  0x70   :  { %1913 = vmatpush1.bf16.msra.mxu1 %v3724_v63 }
  0x71   :  { %2083 = vmatpush1.bf16.msra.mxu0 %v3644_v38  ;;  %1914 = vmatprep.subr.bf16.mxu1 %v3732_v3  ;;  %v3762_v38 = vld [vmem:[%s5546_s3 + $0x1e4] ss:$8 sps:$4 sm:$0xff]   ;;  %v3723_v3 = vld [vmem:[%s5546_s3 + $0x674] ss:$8 sps:$4 sm:$0xff]  }
  0x72   :  { %2084 = vmatprep.subr.bf16.mxu0 %v3652_v39 }
  0x74   :  { %1915 = vmatpush1.bf16.msra.mxu1 %v3730_v15  ;;  %v4662_v15 = vld [vmem:[%s5547_s0 + $0x10] sm:$0xff] }
  0x75   :  { %2085 = vmatpush1.bf16.msra.mxu0 %v3650_v48  ;;  %1916 = vmatprep.subr.bf16.mxu1 %v3738_v17  ;;  %v3760_v48 = vld [vmem:[%s5546_s3 + $0x1e0] ss:$8 sps:$4 sm:$0xff]   ;;  %v3729_v17 = vld [vmem:[%s5546_s3 + $0x684] ss:$8 sps:$4 sm:$0xff]  }
  0x76   :  { %2086 = vmatprep.subr.bf16.mxu0 %v3658_v49  ;;  %v3768_v49 = vld [vmem:[%s5546_s3 + $0x1f4] ss:$8 sps:$4 sm:$0xff]  }
  0x78   :  { %1917 = vmatpush1.bf16.msra.mxu1 %v3736_v42  ;;  %v3790_v42 = vld [vmem:[%s5546_s3 + $0x224] ss:$8 sps:$4 sm:$0xff]  }
  0x79   :  { %2087 = vmatpush1.bf16.msra.mxu0 %v3656_v53  ;;  %1918 = vmatprep.subr.bf16.mxu1 %v3744_v1  ;;  %v3709_v53 = vld [vmem:[%s5546_s3 + $0x650] ss:$8 sps:$4 sm:$0xff]   ;;  %v3727_v1 = vld [vmem:[%s5546_s3 + $0x680] ss:$8 sps:$4 sm:$0xff]  }
  0x7a   :  { %2088 = vmatprep.subr.bf16.mxu0 %v3664_v56  ;;  %v3717_v56 = vld [vmem:[%s5546_s3 + $0x664] ss:$8 sps:$4 sm:$0xff]  }
  0x7c   :  { %1919 = vmatpush1.bf16.msra.mxu1 %v3742_v26 }
  0x7d   :  { %2089 = vmatpush1.bf16.msra.mxu0 %v3662_v61  ;;  %1920 = vmatprep.subr.bf16.mxu1 %v3750_v27  ;;  %v3788_v27 = vld [vmem:[%s5546_s3 + $0x220] ss:$8 sps:$4 sm:$0xff]  }
  0x7e   :  { %2090 = vmatprep.subr.bf16.mxu0 %v3670_v62  ;;  %v3715_v62 = vld [vmem:[%s5546_s3 + $0x660] ss:$8 sps:$4 sm:$0xff]  }
  0x80   :  { %1921 = vmatpush1.bf16.msra.mxu1 %v3748_v31  ;;  %v3741_v31 = vld [vmem:[%s5546_s3 + $0x6a4] ss:$8 sps:$4 sm:$0xff]  }
  0x81   :  { %2091 = vmatpush1.bf16.msra.mxu0 %v3668_v4  ;;  %1922 = vmatprep.subr.bf16.mxu1 %v3756_v19  ;;  %v2994_v4 = vcombine.low %v4500_v41, %v4500_v41  ;;  %v3784_v41 = vld [vmem:[%s5546_s3 + $0x214] ss:$8 sps:$4 sm:$0xff]  }
  0x82   :  { %2101 = vmatprep.subr.bf16.mxu0 %v3681_v13  ;;  %v3774_v13 = vld [vmem:[%s5546_s3 + $0x200] ss:$8 sps:$4 sm:$0xff]  }
  0x84   :  { %2093 = vmatmul.mubr.bf16.vlgmr.msra.gmra.mrb[0].mxu0 %v3002_v16  ;;  %1923 = vmatpush1.bf16.msra.mxu1 %v3754_v36  ;;  %v3721_v16 = vld [vmem:[%s5546_s3 + $0x670] ss:$8 sps:$4 sm:$0xff]   ;;  %v3802_v36 = vld [vmem:[%s5546_s3 + $0x244] ss:$8 sps:$4 sm:$0xff]  }
  0x85   :  { %2102 = vmatpush1.bf16.msra.mxu0 %v3679_v18  ;;  %2133 = vmatprep.mubr.bf16.mxu0 %v3005_v20  ;;  %v2997_v18 = vcombine.high %v4662_v15, %v4662_v15 }
  0x86   :  { %2103 = vmatprep.subr.bf16.mxu0 %v3687_v21  ;;  %1924 = vmatprep.subr.bf16.mxu1 %v3762_v38  ;;  %v3782_v21 = vld [vmem:[%s5546_s3 + $0x210] ss:$8 sps:$4 sm:$0xff]   ;;  %v3739_v38 = vld [vmem:[%s5546_s3 + $0x6a0] ss:$8 sps:$4 sm:$0xff]  }
  0x88   :  { %1925 = vmatpush1.bf16.msra.mxu1 %v3760_v48  ;;  %v3800_v48 = vld [vmem:[%s5546_s3 + $0x240] ss:$8 sps:$4 sm:$0xff]  }
  0x89   :  { %2104 = vmatpush1.bf16.msra.mxu0 %v3685_v22  ;;  %1926 = vmatprep.subr.bf16.mxu1 %v3768_v49  ;;  %v3808_v49 = vld [vmem:[%s5546_s3 + $0x254] ss:$8 sps:$4 sm:$0xff]  }
  0x8a   :  { %2105 = vmatprep.subr.bf16.mxu0 %v3693_v25  ;;  %v3735_v25 = vld [vmem:[%s5546_s3 + $0x694] ss:$8 sps:$4 sm:$0xff]  }
  0x8c   :  { %1927 = vmatpush1.bf16.msra.mxu1 %v3766_v57 }
  0x8d   :  { %2106 = vmatpush1.bf16.msra.mxu0 %v3691_v29  ;;  %1937 = vmatprep.subr.bf16.mxu1 %v3776_v60  ;;  %v3796_v29 = vld [vmem:[%s5546_s3 + $0x234] ss:$8 sps:$4 sm:$0xff]   ;;  %v3753_v60 = vld [vmem:[%s5546_s3 + $0x6c4] ss:$8 sps:$4 sm:$0xff]  }
  0x8e   :  { %2107 = vmatprep.subr.bf16.mxu0 %v3699_v30  ;;  %v3733_v30 = vld [vmem:[%s5546_s3 + $0x690] ss:$8 sps:$4 sm:$0xff]  }
  0x8f   :  { %1929 = vmatmul.mubr.bf16.vlgmr.msra.gmra.mrb[0].mxu1 %v2994_v4  ;;  %v3814_v4 = vld [vmem:[%s5546_s3 + $0x264] ss:$8 sps:$4 sm:$0xff]  }
  0x90   :  { %1938 = vmatpush1.bf16.msra.mxu1 %v3774_v13  ;;  %1969 = vmatprep.mubr.bf16.mxu1 %v2997_v18  ;;  %v3751_v13 = vld [vmem:[%s5546_s3 + $0x6c0] ss:$8 sps:$4 sm:$0xff]  }
  0x91   :  { %2108 = vmatpush1.bf16.msra.mxu0 %v3697_v34  ;;  %1939 = vmatprep.subr.bf16.mxu1 %v3784_v41  ;;  %v3794_v34 = vld [vmem:[%s5546_s3 + $0x230] ss:$8 sps:$4 sm:$0xff]  }
  0x92   :  { %2109 = vmatprep.subr.bf16.mxu0 %v3705_v35 }
  0x94   :  { %v4612_v39 = vpop.xlane.xlu0 %2282  ;;  %v4614_v40 = vpop.xlane.xlu1 %2288  ;;  %1940 = vmatpush1.bf16.msra.mxu1 %v3782_v21  ;;  %v3759_v21 = vld [vmem:[%s5546_s3 + $0x6d4] ss:$8 sps:$4 sm:$0xff]  }
  0x95   :  { %2110 = vmatpush1.bf16.msra.mxu0 %v3703_v44  ;;  %1941 = vmatprep.subr.bf16.mxu1 %v3790_v42  ;;  %v3747_v44 = vld [vmem:[%s5546_s3 + $0x6b4] ss:$8 sps:$4 sm:$0xff]   ;;  %v3812_v42 = vld [vmem:[%s5546_s3 + $0x260] ss:$8 sps:$4 sm:$0xff]  }
  0x96   :  { %2111 = vmatprep.subr.bf16.mxu0 %v3711_v47  ;;  %v342_v47 = vlaneseq }
  0x98   :  { %v4628_v51 = vpop.xlane.xlu0 %2285  ;;  %v4630_v52 = vpop.xlane.xlu1 %2291  ;;  %1942 = vmatpush1.bf16.msra.mxu1 %v3788_v27 }
  0x99   :  { %2112 = vmatpush1.bf16.msra.mxu0 %v3709_v53  ;;  %1943 = vmatprep.subr.bf16.mxu1 %v3796_v29 }
  0x9a   :  { %2113 = vmatprep.subr.bf16.mxu0 %v3717_v56  ;;  %v3745_v56 = vld [vmem:[%s5546_s3 + $0x6b0] ss:$8 sps:$4 sm:$0xff]  }
  0x9c   :  { %v4644_v61 = vpop.xlane.xlu0 %2294  ;;  %v4649_v63 = vpop.xlane.xlu1 %2297  ;;  %1944 = vmatpush1.bf16.msra.mxu1 %v3794_v34 }
  0x9d   :  { %2114 = vmatpush1.bf16.msra.mxu0 %v3715_v62  ;;  %1945 = vmatprep.subr.bf16.mxu1 %v3802_v36  ;;  %v2373_v62 = vand.u32 127, %v342_v47 }
  0x9e   :  { %2115 = vmatprep.subr.bf16.mxu0 %v3723_v3  ;;  %v3806_v3 = vld [vmem:[%s5546_s3 + $0x250] ss:$8 sps:$4 sm:$0xff]  }
  0x9f   :  { %v2378_v41 = vadd.s32 4294967288, %v2373_v62 }
  0xa0   :  { %v4675_v20 = vpop.xlane.xlu0 %2300  ;;  %v4686_v22 = vpop.xlane.xlu1 %2303  ;;  %1946 = vmatpush1.bf16.msra.mxu1 %v3800_v48 }
  0xa1   :  { %2116 = vmatpush1.bf16.msra.mxu0 %v3721_v16  ;;  %1947 = vmatprep.subr.bf16.mxu1 %v3808_v49 }
  0xa2   :  { %2117 = vmatprep.subr.bf16.mxu0 %v3729_v17  ;;  %v4740_v17 = vshrl.u32 %v342_v47, 7 }
  0xa4   :  { %v4691_v26 = vpop.xlane.xlu0 %2306  ;;  %v2310_v35 = vpop.xlane.xlu1 %2309  ;;  %1948 = vmatpush1.bf16.msra.mxu1 %v3806_v3  ;;  %v4752_v27 = vsub.s32 %v2373_v62, %v4740_v17  ;;  %v4755_v29 = vsub.s32 %v2378_v41, %v4740_v17 }
  0xa5   :  { %2118 = vmatpush1.bf16.msra.mxu0 %v3727_v1  ;;  %1949 = vmatprep.subr.bf16.mxu1 %v3814_v4  ;;  %v3820_v1 = vld [vmem:[%s5546_s3 + $0x274] ss:$8 sps:$4 sm:$0xff]  }
  0xa6   :  { %2119 = vmatprep.subr.bf16.mxu0 %v3735_v25 }
  0xa8   :  { %v4705_v19 = vpop.xlane.xlu0 %2312  ;;  %v2316_v57 = vpop.xlane.xlu1 %2315  ;;  %1950 = vmatpush1.bf16.msra.mxu1 %v3812_v42 }
  0xa9   :  { %2120 = vmatpush1.bf16.msra.mxu0 %v3733_v30  ;;  %v3757_v30 = vld [vmem:[%s5546_s3 + $0x6d0] ss:$8 sps:$4 sm:$0xff]   ;;  %1951 = vmatprep.subr.bf16.mxu1 %v3820_v1 }
  0xaa   :  { %2121 = vmatprep.subr.bf16.mxu0 %v3741_v31 }
  0xac   :  { %v2319_v53 = vpop.xlane.xlu0 %2318  ;;  %v2322_v18 = vpop.xlane.xlu1 %2321 }
  0xad   :  { %2122 = vmatpush1.bf16.msra.mxu0 %v3739_v38 }
  0xae   :  { %2123 = vmatprep.subr.bf16.mxu0 %v3747_v44  ;;  %v3765_v44 = vld [vmem:[%s5546_s3 + $0x6e4] ss:$8 sps:$4 sm:$0xff]  }
  0xb0   :  { %v2325_v16 = vpop.xlane.xlu0 %2324 }
  0xb1   :  { %2124 = vmatpush1.bf16.msra.mxu0 %v3745_v56 }
  0xb2   :  { %2125 = vmatprep.subr.bf16.mxu0 %v3753_v60 }
  0xb5   :  { %2126 = vmatpush1.bf16.msra.mxu0 %v3751_v13 }
  0xb6   :  { %2127 = vmatprep.subr.bf16.mxu0 %v3759_v21 }
  0xb8   :  { %v2337_v25 = vpop.permute.xlu0 %2336 }
  0xb9   :  { %v2339_v31 = vadd.f32 %v2337_v25, %v4612_v39  ;;  %v2340_v34 = vadd.f32 %v2337_v25, %v4628_v51  ;;  %v2341_v36 = vadd.f32 %v2337_v25, %v4614_v40  ;;  %v2342_v38 = vadd.f32 %v2337_v25, %v4630_v52  ;;  %v3818_v39 = vld [vmem:[%s5546_s3 + $0x270] ss:$8 sps:$4 sm:$0xff]   ;;  %v2328_v51 = vpop.xlane.xlu1 %2327  ;;  %2128 = vmatpush1.bf16.msra.mxu0 %v3757_v30 }
  0xba   :  { %v2343_v47 = vadd.f32 %v2337_v25, %v4644_v61  ;;  %v2344_v48 = vadd.f32 %v2337_v25, %v4649_v63  ;;  %v2345_v40 = vadd.f32 %v2337_v25, %v4675_v20  ;;  %v2346_v52 = vadd.f32 %v2337_v25, %v4686_v22  ;;  %v3826_v61 = vld [vmem:[%s5546_s3 + $0x284] ss:$8 sps:$4 sm:$0xff]   ;;  %v3763_v20 = vld [vmem:[%s5546_s3 + $0x6e0] ss:$8 sps:$4 sm:$0xff]   ;;  %2129 = vmatprep.subr.bf16.mxu0 %v3765_v44 }
  0xbb   :  { %v2347_v49 = vadd.f32 %v2337_v25, %v4691_v26  ;;  %v2348_v56 = vadd.f32 %v2337_v25, %v2310_v35  ;;  %v2349_v63 = vadd.f32 %v2337_v25, %v4705_v19  ;;  %v2350_v60 = vadd.f32 %v2337_v25, %v2316_v57  ;;  %v3771_v19 = vld [vmem:[%s5546_s3 + $0x6f4] ss:$8 sps:$4 sm:$0xff]   ;;  %1952 = vmatpush1.bf16.msra.mxu1 %v3818_v39 }
  0xbc   :  { %v4779_v62 = vadd.f32 %v2337_v25, %v2319_v53  ;;  %v2352_v3 = vadd.f32 %v2337_v25, %v2322_v18  ;;  %v2377_v22 = vrot.slane %v2339_v31, %v4752_v27  ;;  %v2382_v26 = vrot.slane %v2340_v34, %v4755_v29  ;;  %v3824_v18 = vld [vmem:[%s5546_s3 + $0x280] ss:$8 sps:$4 sm:$0xff]   ;;  %1953 = vmatprep.subr.bf16.mxu1 %v3826_v61 }
  0xbd   :  { %v2388_v35 = vrot.slane %v2341_v36, %v4752_v27  ;;  %v2392_v4 = vrot.slane %v2342_v38, %v4755_v29  ;;  %v2353_v53 = vadd.f32 %v2337_v25, %v2325_v16  ;;  %v2354_v57 = vadd.f32 %v2337_v25, %v2328_v51  ;;  %v3832_v16 = vld [vmem:[%s5546_s3 + $0x294] ss:$8 sps:$4 sm:$0xff]   ;;  %2130 = vmatpush1.bf16.msra.mxu0 %v3763_v20  ;;  %v3769_v36 = vld [vmem:[%s5546_s3 + $0x6f0] ss:$8 sps:$4 sm:$0xff]  }
  0xbe   :  { %v2397_v13 = vrot.slane %v2343_v47, %v4752_v27  ;;  %v2401_v41 = vrot.slane %v2344_v48, %v4755_v29  ;;  %v2384_v21 = vsel %vm2383_vm1, %v2382_v26, %v2377_v22  ;;  %v2406_v1 = vrot.slane %v2345_v40, %v4752_v27  ;;  %2131 = vmatprep.subr.bf16.mxu0 %v3771_v19  ;;  %v3781_v47 = vld [vmem:[%s5546_s3 + $0x704] ss:$8 sps:$4 sm:$0xff]   ;;  %v4817_v48 = vld [vmem:[%s5547_s0 + $0x38] sm:$0xff]  ;;  %v3779_v22 = vld [vmem:[%s5546_s3 + $0x700] ss:$8 sps:$4 sm:$0xff]  }
  0xbf   :  { %v2393_v42 = vsel %vm2383_vm1, %v2392_v4, %v2388_v35  ;;  %v2410_v30 = vrot.slane %v2346_v52, %v4755_v29  ;;  %v2415_v31 = vrot.slane %v2347_v49, %v4752_v27  ;;  %v2419_v34 = vrot.slane %v2348_v56, %v4755_v29  ;;  %1954 = vmatpush1.bf16.msra.mxu1 %v3824_v18  ;;  %v3830_v49 = vld [vmem:[%s5546_s3 + $0x290] ss:$8 sps:$4 sm:$0xff]   ;;  %v4831_v56 = vld [vmem:[%s5548_s2] sm:$0xff]  ;;  %v3787_v35 = vld [vmem:[%s5546_s3 + $0x714] ss:$8 sps:$4 sm:$0xff]  }
  0xc0   :  { %v2402_v25 = vsel %vm2383_vm1, %v2401_v41, %v2397_v13  ;;  %v2424_v38 = vrot.slane %v2349_v63, %v4752_v27  ;;  %v2428_v44 = vrot.slane %v2350_v60, %v4755_v29  ;;  %v2433_v39 = vrot.slane %v4779_v62, %v4752_v27  ;;  %1955 = vmatprep.subr.bf16.mxu1 %v3832_v16  ;;  %v3844_v41 = vld [vmem:[%s5546_s3 + $0x2b4] ss:$8 sps:$4 sm:$0xff]   ;;  %v3842_v16 = vld [vmem:[%s5546_s3 + $0x2b0] ss:$8 sps:$4 sm:$0xff]  }
  0xc1   :  { %v2437_v51 = vrot.slane %v2352_v3, %v4755_v29  ;;  %v2449_v40 = vsel %vm2448_vm2, %v2393_v42, %v2384_v21  ;;  %v3004_v52 = vcombine.low %v4552_v14, %v4552_v14  ;;  %v2411_v61 = vsel %vm2383_vm1, %v2410_v30, %v2406_v1  ;;  %v3838_v14 = vld [vmem:[%s5546_s3 + $0x2a4] ss:$8 sps:$4 sm:$0xff]   ;;  %2132 = vmatpush1.bf16.msra.mxu0 %v3769_v36  ;;  %v3785_v21 = vld [vmem:[%s5546_s3 + $0x710] ss:$8 sps:$4 sm:$0xff]   ;;  %v3848_v36 = vld [vmem:[%s5546_s3 + $0x2c0] ss:$8 sps:$4 sm:$0xff]  }
  0xc2   :  { %v2442_v63 = vrot.slane %v2353_v53, %v4752_v27  ;;  %v2446_v60 = vrot.slane %v2354_v57, %v4755_v29  ;;  %v2451_v62 = vsel %vm2450_vm3, %v2402_v25, %v2449_v40  ;;  %v2420_v3 = vsel %vm2383_vm1, %v2419_v34, %v2415_v31  ;;  %2142 = vmatprep.subr.bf16.mxu0 %v3781_v47  ;;  %v3836_v53 = vld [vmem:[%s5546_s3 + $0x2a0] ss:$8 sps:$4 sm:$0xff]   ;;  %v3793_v1 = vld [vmem:[%s5546_s3 + $0x724] ss:$8 sps:$4 sm:$0xff]   ;;  %v3799_v34 = vld [vmem:[%s5546_s3 + $0x734] ss:$8 sps:$4 sm:$0xff]  }
  0xc3   :  { %v2453_v20 = vsel %vm2452_vm4, %v2411_v61, %v2451_v62  ;;  %v3007_v27 = vcombine.high %v4817_v48, %v4817_v48  ;;  %v2429_v29 = vsel %vm2383_vm1, %v2428_v44, %v2424_v38  ;;  %vm2355_vm9 = vcmp.gt.f32.partialorder %v4831_v56, 0.0  ;;  %1956 = vmatpush1.bf16.msra.mxu1 %v3830_v49  ;;  %v3850_v25 = vld [vmem:[%s5546_s3 + $0x2c4] ss:$8 sps:$4 sm:$0xff]   ;;  %v3791_v31 = vld [vmem:[%s5546_s3 + $0x720] ss:$8 sps:$4 sm:$0xff]  }
  0xc4   :  { %v2455_v26 = vsel %vm2454_vm5, %v2420_v3, %v2453_v20  ;;  %v2438_v4 = vsel %vm2383_vm1, %v2437_v51, %v2433_v39  ;;  %v2447_v57 = vsel %vm2383_vm1, %v2446_v60, %v2442_v63  ;;  %2134 = vmatmul.mubr.bf16.vlgmr.msra.gmra.mrb[0].mxu0 %v3004_v52  ;;  %1957 = vmatprep.subr.bf16.mxu1 %v3838_v14  ;;  %v3856_v38 = vld [vmem:[%s5546_s3 + $0x2d4] ss:$8 sps:$4 sm:$0xff]   ;;  %v3797_v44 = vld [vmem:[%s5546_s3 + $0x730] ss:$8 sps:$4 sm:$0xff]   ;;  %v3805_v47 = vld [vmem:[%s5546_s3 + $0x744] ss:$8 sps:$4 sm:$0xff]  }
  0xc5   :  { %v2457_v19 = vsel %vm2456_vm6, %v2429_v29, %v2455_v26  ;;  %2143 = vmatpush1.bf16.msra.mxu0 %v3779_v22  ;;  %2174 = vmatprep.mubr.bf16.mxu0 %v3007_v27  ;;  %v3854_v39 = vld [vmem:[%s5546_s3 + $0x2d0] ss:$8 sps:$4 sm:$0xff]   ;;  %v3862_v51 = vld [vmem:[%s5546_s3 + $0x2e4] ss:$8 sps:$4 sm:$0xff]   ;;  %v3803_v40 = vld [vmem:[%s5546_s3 + $0x740] ss:$8 sps:$4 sm:$0xff]   ;;  %v2996_v22 = vcombine.low %v4662_v15, %v4662_v15 }
  0xc6   :  { %v2459_v13 = vsel %vm2458_vm7, %v2438_v4, %v2457_v19  ;;  %2144 = vmatprep.subr.bf16.mxu0 %v3787_v35  ;;  %v3811_v52 = vld [vmem:[%s5546_s3 + $0x754] ss:$8 sps:$4 sm:$0xff]   ;;  %v3860_v49 = vld [vmem:[%s5546_s3 + $0x2e0] ss:$8 sps:$4 sm:$0xff]   ;;  %v3809_v63 = vld [vmem:[%s5546_s3 + $0x750] ss:$8 sps:$4 sm:$0xff]  }
  0xc7   :  { %v2461_v18 = vsel %vm2460_vm8, %v2447_v57, %v2459_v13  ;;  %1958 = vmatpush1.bf16.msra.mxu1 %v3836_v53  ;;  %v3868_v61 = vld [vmem:[%s5546_s3 + $0x2f4] ss:$8 sps:$4 sm:$0xff]   ;;  %v3817_v60 = vld [vmem:[%s5546_s3 + $0x764] ss:$8 sps:$4 sm:$0xff]   ;;  %v3866_v62 = vld [vmem:[%s5546_s3 + $0x2f0] ss:$8 sps:$4 sm:$0xff]  }
  0xc8   :  { %v4867_v42 = vsel %vm2355_vm9, %v2461_v18, -1e+30  ;;  %1959 = vmatprep.subr.bf16.mxu1 %v3844_v41  ;;  %v3876_v14 = vld [vmem:[%s5546_s3 + $0x304] ss:$8 sps:$4 sm:$0xff]   ;;  %v3815_v3 = vld [vmem:[%s5546_s3 + $0x760] ss:$8 sps:$4 sm:$0xff]  }
  0xc9   :  { %v2465_v30 = vsel %vm2464_vm10, %v4867_v42, -inf  ;;  %2145 = vmatpush1.bf16.msra.mxu0 %v3785_v21  ;;  %v3823_v20 = vld [vmem:[%s5546_s3 + $0x774] ss:$8 sps:$4 sm:$0xff]   ;;  %v3874_v27 = vld [vmem:[%s5546_s3 + $0x300] ss:$8 sps:$4 sm:$0xff]  }
  0xca   :  { %2466 = vmax.xlane.f32.xlu1 %v2465_v30  ;;  %2146 = vmatprep.subr.bf16.mxu0 %v3793_v1  ;;  %v3884_v29 = vld [vmem:[%s5546_s3 + $0x314] ss:$8 sps:$4 sm:$0xff]   ;;  %v3821_v26 = vld [vmem:[%s5546_s3 + $0x770] ss:$8 sps:$4 sm:$0xff]   ;;  %v3829_v15 = vld [vmem:[%s5546_s3 + $0x784] ss:$8 sps:$4 sm:$0xff]  }
  0xcb   :  { %1960 = vmatpush1.bf16.msra.mxu1 %v3842_v16  ;;  %v3882_v35 = vld [vmem:[%s5546_s3 + $0x310] ss:$8 sps:$4 sm:$0xff]   ;;  %v3890_v4 = vld [vmem:[%s5546_s3 + $0x324] ss:$8 sps:$4 sm:$0xff]   ;;  %v3827_v19 = vld [vmem:[%s5546_s3 + $0x780] ss:$8 sps:$4 sm:$0xff]  }
  0xcc   :  { %1961 = vmatprep.subr.bf16.mxu1 %v3850_v25  ;;  %v3835_v53 = vld [vmem:[%s5546_s3 + $0x794] ss:$8 sps:$4 sm:$0xff]   ;;  %v3888_v57 = vld [vmem:[%s5546_s3 + $0x320] ss:$8 sps:$4 sm:$0xff]   ;;  %v3833_v41 = vld [vmem:[%s5546_s3 + $0x790] ss:$8 sps:$4 sm:$0xff]  }
  0xcd   :  { %2147 = vmatpush1.bf16.msra.mxu0 %v3791_v31  ;;  %v3896_v13 = vld [vmem:[%s5546_s3 + $0x334] ss:$8 sps:$4 sm:$0xff]   ;;  %v3841_v18 = vld [vmem:[%s5546_s3 + $0x7a4] ss:$8 sps:$4 sm:$0xff]   ;;  %v3894_v21 = vld [vmem:[%s5546_s3 + $0x330] ss:$8 sps:$4 sm:$0xff]  }
  0xce   :  { %2148 = vmatprep.subr.bf16.mxu0 %v3799_v34  ;;  %v3902_v1 = vld [vmem:[%s5546_s3 + $0x344] ss:$8 sps:$4 sm:$0xff]   ;;  %v3839_v30 = vld [vmem:[%s5546_s3 + $0x7a0] ss:$8 sps:$4 sm:$0xff]   ;;  %v3847_v16 = vld [vmem:[%s5546_s3 + $0x7b4] ss:$8 sps:$4 sm:$0xff]  }
  0xcf   :  { %1962 = vmatpush1.bf16.msra.mxu1 %v3848_v36  ;;  %v3900_v25 = vld [vmem:[%s5546_s3 + $0x340] ss:$8 sps:$4 sm:$0xff]   ;;  %v3908_v31 = vld [vmem:[%s5546_s3 + $0x354] ss:$8 sps:$4 sm:$0xff]   ;;  %v3845_v34 = vld [vmem:[%s5546_s3 + $0x7b0] ss:$8 sps:$4 sm:$0xff]  }
  0xd0   :  { %1963 = vmatprep.subr.bf16.mxu1 %v3856_v38  ;;  %v3853_v36 = vld [vmem:[%s5546_s3 + $0x7c4] ss:$8 sps:$4 sm:$0xff]   ;;  %v3906_v38 = vld [vmem:[%s5546_s3 + $0x350] ss:$8 sps:$4 sm:$0xff]  }
  0xd1   :  { %2149 = vmatpush1.bf16.msra.mxu0 %v3797_v44  ;;  %v3914_v44 = vld [vmem:[%s5546_s3 + $0x364] ss:$8 sps:$4 sm:$0xff]  }
  0xd2   :  { %2150 = vmatprep.subr.bf16.mxu0 %v3805_v47  ;;  %v3851_v47 = vld [vmem:[%s5546_s3 + $0x7c0] ss:$8 sps:$4 sm:$0xff]  }
  0xd3   :  { %1964 = vmatpush1.bf16.msra.mxu1 %v3854_v39  ;;  %v3859_v39 = vld [vmem:[%s5546_s3 + $0x7d4] ss:$8 sps:$4 sm:$0xff]  }
  0xd4   :  { %1965 = vmatprep.subr.bf16.mxu1 %v3862_v51  ;;  %v3912_v51 = vld [vmem:[%s5546_s3 + $0x360] ss:$8 sps:$4 sm:$0xff]  }
  0xd5   :  { %2151 = vmatpush1.bf16.msra.mxu0 %v3803_v40  ;;  %v5014_v40 = vld [vmem:[%s5547_s0 + $0x18] sm:$0xff] }
  0xd6   :  { %2152 = vmatprep.subr.bf16.mxu0 %v3811_v52  ;;  %v3920_v52 = vld [vmem:[%s5546_s3 + $0x374] ss:$8 sps:$4 sm:$0xff]  }
  0xd7   :  { %1966 = vmatpush1.bf16.msra.mxu1 %v3860_v49  ;;  %v2999_v49 = vcombine.high %v5014_v40, %v5014_v40 }
  0xd8   :  { %1967 = vmatprep.subr.bf16.mxu1 %v3868_v61  ;;  %v3857_v61 = vld [vmem:[%s5546_s3 + $0x7d0] ss:$8 sps:$4 sm:$0xff]  }
  0xd9   :  { %2153 = vmatpush1.bf16.msra.mxu0 %v3809_v63  ;;  %v3865_v63 = vld [vmem:[%s5546_s3 + $0x7e4] ss:$8 sps:$4 sm:$0xff]  }
  0xda   :  { %2154 = vmatprep.subr.bf16.mxu0 %v3817_v60  ;;  %v3918_v60 = vld [vmem:[%s5546_s3 + $0x370] ss:$8 sps:$4 sm:$0xff]  }
  0xdb   :  { %1968 = vmatpush1.bf16.msra.mxu1 %v3866_v62  ;;  %v3926_v62 = vld [vmem:[%s5546_s3 + $0x384] ss:$8 sps:$4 sm:$0xff]  }
  0xdc   :  { %1978 = vmatprep.subr.bf16.mxu1 %v3876_v14  ;;  %v3863_v14 = vld [vmem:[%s5546_s3 + $0x7e0] ss:$8 sps:$4 sm:$0xff]  }
  0xdd   :  { %2155 = vmatpush1.bf16.msra.mxu0 %v3815_v3  ;;  %v3871_v3 = vld [vmem:[%s5546_s3 + $0x7f4] ss:$8 sps:$4 sm:$0xff]  }
  0xde   :  { %2156 = vmatprep.subr.bf16.mxu0 %v3823_v20  ;;  %1970 = vmatmul.mubr.bf16.vlgmr.msra.gmra.mrb[0].mxu1 %v2996_v22  ;;  %v3924_v20 = vld [vmem:[%s5546_s3 + $0x380] ss:$8 sps:$4 sm:$0xff]   ;;  %v3932_v22 = vld [vmem:[%s5546_s3 + $0x394] ss:$8 sps:$4 sm:$0xff]  }
  0xdf   :  { %1979 = vmatpush1.bf16.msra.mxu1 %v3874_v27  ;;  %2010 = vmatprep.mubr.bf16.mxu1 %v2999_v49  ;;  %v3869_v27 = vld [vmem:[%s5546_s3 + $0x7f0] ss:$8 sps:$4 sm:$0xff]  }
  0xe0   :  { %1980 = vmatprep.subr.bf16.mxu1 %v3884_v29  ;;  %v3881_v29 = vld [vmem:[%s5546_s3 + $0x804] ss:$8 sps:$4 sm:$0xff]   ;;  %v3909_v49 = vld [vmem:[%s5546_s3 + $0x850] ss:$8 sps:$4 sm:$0xff]  }
  0xe1   :  { %2157 = vmatpush1.bf16.msra.mxu0 %v3821_v26  ;;  %v5054_v26 = vld [vmem:[%s5547_s0 + $0x40] sm:$0xff] }
  0xe2   :  { %2158 = vmatprep.subr.bf16.mxu0 %v3829_v15  ;;  %v3930_v15 = vld [vmem:[%s5546_s3 + $0x390] ss:$8 sps:$4 sm:$0xff]  }
  0xe3   :  { %1981 = vmatpush1.bf16.msra.mxu1 %v3882_v35  ;;  %v3006_v35 = vcombine.low %v4817_v48, %v4817_v48  ;;  %v3936_v48 = vld [vmem:[%s5546_s3 + $0x3a0] ss:$8 sps:$4 sm:$0xff]  }
  0xe4   :  { %1982 = vmatprep.subr.bf16.mxu1 %v3890_v4  ;;  %v3938_v4 = vld [vmem:[%s5546_s3 + $0x3a4] ss:$8 sps:$4 sm:$0xff]  }
  0xe5   :  { %2159 = vmatpush1.bf16.msra.mxu0 %v3827_v19  ;;  %v3879_v19 = vld [vmem:[%s5546_s3 + $0x800] ss:$8 sps:$4 sm:$0xff]  }
  0xe6   :  { %2160 = vmatprep.subr.bf16.mxu0 %v3835_v53  ;;  %v3009_v53 = vcombine.high %v5054_v26, %v5054_v26 }
  0xe7   :  { %1983 = vmatpush1.bf16.msra.mxu1 %v3888_v57  ;;  %v3887_v57 = vld [vmem:[%s5546_s3 + $0x814] ss:$8 sps:$4 sm:$0xff]  }
  0xe8   :  { %1984 = vmatprep.subr.bf16.mxu1 %v3896_v13  ;;  %v3944_v13 = vld [vmem:[%s5546_s3 + $0x3b4] ss:$8 sps:$4 sm:$0xff]  }
  0xe9   :  { %2161 = vmatpush1.bf16.msra.mxu0 %v3833_v41  ;;  %v3885_v41 = vld [vmem:[%s5546_s3 + $0x810] ss:$8 sps:$4 sm:$0xff]  }
  0xea   :  { %2162 = vmatprep.subr.bf16.mxu0 %v3841_v18  ;;  %v3893_v18 = vld [vmem:[%s5546_s3 + $0x824] ss:$8 sps:$4 sm:$0xff]  }
  0xeb   :  { %1985 = vmatpush1.bf16.msra.mxu1 %v3894_v21  ;;  %v3942_v21 = vld [vmem:[%s5546_s3 + $0x3b0] ss:$8 sps:$4 sm:$0xff]  }
  0xec   :  { %1986 = vmatprep.subr.bf16.mxu1 %v3902_v1  ;;  %v3950_v1 = vld [vmem:[%s5546_s3 + $0x3c4] ss:$8 sps:$4 sm:$0xff]  }
  0xed   :  { %2163 = vmatpush1.bf16.msra.mxu0 %v3839_v30  ;;  %v3891_v30 = vld [vmem:[%s5546_s3 + $0x820] ss:$8 sps:$4 sm:$0xff]  }
  0xee   :  { %2164 = vmatprep.subr.bf16.mxu0 %v3847_v16  ;;  %v3899_v16 = vld [vmem:[%s5546_s3 + $0x834] ss:$8 sps:$4 sm:$0xff]  }
  0xef   :  { %1987 = vmatpush1.bf16.msra.mxu1 %v3900_v25  ;;  %v3948_v25 = vld [vmem:[%s5546_s3 + $0x3c0] ss:$8 sps:$4 sm:$0xff]  }
  0xf0   :  { %1988 = vmatprep.subr.bf16.mxu1 %v3908_v31  ;;  %v3956_v31 = vld [vmem:[%s5546_s3 + $0x3d4] ss:$8 sps:$4 sm:$0xff]  }
  0xf1   :  { %2165 = vmatpush1.bf16.msra.mxu0 %v3845_v34  ;;  %v3897_v34 = vld [vmem:[%s5546_s3 + $0x830] ss:$8 sps:$4 sm:$0xff]  }
  0xf2   :  { %2166 = vmatprep.subr.bf16.mxu0 %v3853_v36  ;;  %v3905_v36 = vld [vmem:[%s5546_s3 + $0x844] ss:$8 sps:$4 sm:$0xff]  }
  0xf3   :  { %1989 = vmatpush1.bf16.msra.mxu1 %v3906_v38  ;;  %v3954_v38 = vld [vmem:[%s5546_s3 + $0x3d0] ss:$8 sps:$4 sm:$0xff]  }
  0xf4   :  { %1990 = vmatprep.subr.bf16.mxu1 %v3914_v44  ;;  %v3962_v44 = vld [vmem:[%s5546_s3 + $0x3e4] ss:$8 sps:$4 sm:$0xff]  }
  0xf5   :  { %2167 = vmatpush1.bf16.msra.mxu0 %v3851_v47  ;;  %v3903_v47 = vld [vmem:[%s5546_s3 + $0x840] ss:$8 sps:$4 sm:$0xff]  }
  0xf6   :  { %2168 = vmatprep.subr.bf16.mxu0 %v3859_v39  ;;  %v3911_v39 = vld [vmem:[%s5546_s3 + $0x854] ss:$8 sps:$4 sm:$0xff]  }
  0xf7   :  { %1991 = vmatpush1.bf16.msra.mxu1 %v3912_v51  ;;  %v3960_v51 = vld [vmem:[%s5546_s3 + $0x3e0] ss:$8 sps:$4 sm:$0xff]  }
  0xf8   :  { %1992 = vmatprep.subr.bf16.mxu1 %v3920_v52  ;;  %v3968_v52 = vld [vmem:[%s5546_s3 + $0x3f4] ss:$8 sps:$4 sm:$0xff]  }
  0xf9   :  { %2169 = vmatpush1.bf16.msra.mxu0 %v3857_v61  ;;  %v3917_v61 = vld [vmem:[%s5546_s3 + $0x864] ss:$8 sps:$4 sm:$0xff]  }
  0xfa   :  { %2170 = vmatprep.subr.bf16.mxu0 %v3865_v63  ;;  %v3966_v63 = vld [vmem:[%s5546_s3 + $0x3f0] ss:$8 sps:$4 sm:$0xff]  }
  0xfb   :  { %1993 = vmatpush1.bf16.msra.mxu1 %v3918_v60  ;;  %v3915_v60 = vld [vmem:[%s5546_s3 + $0x860] ss:$8 sps:$4 sm:$0xff]  }
  0xfc   :  { %1994 = vmatprep.subr.bf16.mxu1 %v3926_v62  ;;  %v3923_v62 = vld [vmem:[%s5546_s3 + $0x874] ss:$8 sps:$4 sm:$0xff]  }
  0xfd   :  { %2171 = vmatpush1.bf16.msra.mxu0 %v3863_v14  ;;  %v2998_v14 = vcombine.low %v5014_v40, %v5014_v40  ;;  %v3935_v40 = vld [vmem:[%s5546_s3 + $0x894] ss:$8 sps:$4 sm:$0xff]  }
  0xfe   :  { %2172 = vmatprep.subr.bf16.mxu0 %v3871_v3  ;;  %v3921_v3 = vld [vmem:[%s5546_s3 + $0x870] ss:$8 sps:$4 sm:$0xff]  }
  0xff   :  { %1995 = vmatpush1.bf16.msra.mxu1 %v3924_v20  ;;  %v3929_v20 = vld [vmem:[%s5546_s3 + $0x884] ss:$8 sps:$4 sm:$0xff]  }
 0x100   :  { %1996 = vmatprep.subr.bf16.mxu1 %v3932_v22  ;;  %v3927_v22 = vld [vmem:[%s5546_s3 + $0x880] ss:$8 sps:$4 sm:$0xff]  }
 0x101   :  { %2173 = vmatpush1.bf16.msra.mxu0 %v3869_v27  ;;  %v3933_v27 = vld [vmem:[%s5546_s3 + $0x890] ss:$8 sps:$4 sm:$0xff]  }
 0x102   :  { %2183 = vmatprep.subr.bf16.mxu0 %v3881_v29  ;;  %v3941_v29 = vld [vmem:[%s5546_s3 + $0x8a4] ss:$8 sps:$4 sm:$0xff]  }
 0x103   :  { %1997 = vmatpush1.bf16.msra.mxu1 %v3930_v15  ;;  %v3939_v15 = vld [vmem:[%s5546_s3 + $0x8a0] ss:$8 sps:$4 sm:$0xff]  }
 0x104   :  { %2175 = vmatmul.mubr.bf16.vlgmr.msra.gmra.mrb[0].mxu0 %v3006_v35  ;;  %1998 = vmatprep.subr.bf16.mxu1 %v3938_v4  ;;  %v3947_v35 = vld [vmem:[%s5546_s3 + $0x8b4] ss:$8 sps:$4 sm:$0xff]   ;;  %v3945_v4 = vld [vmem:[%s5546_s3 + $0x8b0] ss:$8 sps:$4 sm:$0xff]  }
 0x105   :  { %2184 = vmatpush1.bf16.msra.mxu0 %v3879_v19  ;;  %2215 = vmatprep.mubr.bf16.mxu0 %v3009_v53  ;;  %v3953_v19 = vld [vmem:[%s5546_s3 + $0x8c4] ss:$8 sps:$4 sm:$0xff]   ;;  %v3951_v53 = vld [vmem:[%s5546_s3 + $0x8c0] ss:$8 sps:$4 sm:$0xff]  }
 0x106   :  { %2185 = vmatprep.subr.bf16.mxu0 %v3887_v57  ;;  %v3959_v57 = vld [vmem:[%s5546_s3 + $0x8d4] ss:$8 sps:$4 sm:$0xff]  }
 0x107   :  { %1999 = vmatpush1.bf16.msra.mxu1 %v3936_v48  ;;  %v3957_v48 = vld [vmem:[%s5546_s3 + $0x8d0] ss:$8 sps:$4 sm:$0xff]  }
 0x108   :  { %2000 = vmatprep.subr.bf16.mxu1 %v3944_v13  ;;  %v3965_v13 = vld [vmem:[%s5546_s3 + $0x8e4] ss:$8 sps:$4 sm:$0xff]  }
 0x109   :  { %2186 = vmatpush1.bf16.msra.mxu0 %v3885_v41  ;;  %v3963_v41 = vld [vmem:[%s5546_s3 + $0x8e0] ss:$8 sps:$4 sm:$0xff]  }
 0x10a   :  { %2187 = vmatprep.subr.bf16.mxu0 %v3893_v18  ;;  %v3971_v18 = vld [vmem:[%s5546_s3 + $0x8f4] ss:$8 sps:$4 sm:$0xff]  }
 0x10b   :  { %2001 = vmatpush1.bf16.msra.mxu1 %v3942_v21  ;;  %v3969_v21 = vld [vmem:[%s5546_s3 + $0x8f0] ss:$8 sps:$4 sm:$0xff]  }
 0x10c   :  { %2002 = vmatprep.subr.bf16.mxu1 %v3950_v1  ;;  %v3008_v1 = vcombine.low %v5054_v26, %v5054_v26  ;;  %v2512_v26 = vsub.s32 3, %v4740_v17 }
 0x10d   :  { %2188 = vmatpush1.bf16.msra.mxu0 %v3891_v30 }
 0x10e   :  { %2189 = vmatprep.subr.bf16.mxu0 %v3899_v16 }
 0x10f   :  { %2003 = vmatpush1.bf16.msra.mxu1 %v3948_v25 }
 0x110   :  { %2004 = vmatprep.subr.bf16.mxu1 %v3956_v31 }
 0x111   :  { %2190 = vmatpush1.bf16.msra.mxu0 %v3897_v34 }
 0x112   :  { %2191 = vmatprep.subr.bf16.mxu0 %v3905_v36 }
 0x113   :  { %2005 = vmatpush1.bf16.msra.mxu1 %v3954_v38 }
 0x114   :  { %2006 = vmatprep.subr.bf16.mxu1 %v3962_v44 }
 0x115   :  { %2192 = vmatpush1.bf16.msra.mxu0 %v3903_v47 }
 0x116   :  { %2193 = vmatprep.subr.bf16.mxu0 %v3911_v39 }
 0x117   :  { %2007 = vmatpush1.bf16.msra.mxu1 %v3960_v51 }
 0x118   :  { %2008 = vmatprep.subr.bf16.mxu1 %v3968_v52 }
 0x119   :  { %2194 = vmatpush1.bf16.msra.mxu0 %v3909_v49  ;;  %v5200_v49 = vsub.s32 0, %v4740_v17 }
 0x11a   :  { %2195 = vmatprep.subr.bf16.mxu0 %v3917_v61 }
 0x11b   :  { %2009 = vmatpush1.bf16.msra.mxu1 %v3966_v63 }
 0x11d   :  { %2196 = vmatpush1.bf16.msra.mxu0 %v3915_v60  ;;  %v2523_v60 = vsub.s32 4, %v4740_v17 }
 0x11e   :  { %2197 = vmatprep.subr.bf16.mxu0 %v3923_v62  ;;  %2011 = vmatmul.mubr.bf16.vlgmr.msra.gmra.mrb[0].mxu1 %v2998_v14  ;;  %v2534_v14 = vsub.s32 5, %v4740_v17 }
 0x121   :  { %2198 = vmatpush1.bf16.msra.mxu0 %v3921_v3  ;;  %v5212_v3 = vsub.s32 1, %v4740_v17 }
 0x122   :  { %2199 = vmatprep.subr.bf16.mxu0 %v3929_v20 }
 0x125   :  { %2200 = vmatpush1.bf16.msra.mxu0 %v3927_v22  ;;  %v2545_v22 = vsub.s32 6, %v4740_v17 }
 0x126   :  { %2201 = vmatprep.subr.bf16.mxu0 %v3935_v40  ;;  %v340_v40 = vld [vmem:[%s5549_s4] sm:$0x3] }
 0x129   :  { %2202 = vmatpush1.bf16.msra.mxu0 %v3933_v27 }
 0x12a   :  { %2203 = vmatprep.subr.bf16.mxu0 %v3941_v29  ;;  %v2556_v29 = vsub.s32 7, %v4740_v17 }
 0x12d   :  { %2204 = vmatpush1.bf16.msra.mxu0 %v3939_v15  ;;  %v2501_v15 = vsub.s32 2, %v4740_v17 }
 0x12e   :  { %2205 = vmatprep.subr.bf16.mxu0 %v3947_v35  ;;  %v345_v35 = vrot.slane %v340_v40, %v5200_v49 }
 0x131   :  { %2206 = vmatpush1.bf16.msra.mxu0 %v3945_v4  ;;  %v349_v4 = vrot.slane %v340_v40, %v5212_v3  ;;  %v2668_v40 = vld [vmem:[%s5550_s7 + $0x60] sm:$0xff] }
 0x132   :  { %2207 = vmatprep.subr.bf16.mxu0 %v3953_v19 }
 0x135   :  { %2208 = vmatpush1.bf16.msra.mxu0 %v3951_v53 }
 0x136   :  { %2209 = vmatprep.subr.bf16.mxu0 %v3959_v57 }
 0x139   :  { %2210 = vmatpush1.bf16.msra.mxu0 %v3957_v48 }
 0x13a   :  { %2211 = vmatprep.subr.bf16.mxu0 %v3965_v13 }
 0x13d   :  { %2212 = vmatpush1.bf16.msra.mxu0 %v3963_v41 }
 0x13e   :  { %2213 = vmatprep.subr.bf16.mxu0 %v3971_v18 }
 0x141   :  { %2214 = vmatpush1.bf16.msra.mxu0 %v3969_v21 }
 0x144   :  { %2216 = vmatmul.mubr.bf16.vlgmr.msra.gmra.mrb[0].mxu0 %v3008_v1 }
 0x157   :  { %v2467_v30 = vpop.xlane.xlu1 %2466 }
 0x158   :  { %v2468_v16 = vsub.f32 %v4867_v42, %v2467_v30  ;;  %v2657_v30 = vld [vmem:[%s5550_s7 + $0x8] sm:$0xff] }
 0x15a   :  { %v2469_v25 = vmul.f32 1.442695, %v2468_v16  ;;  %v2659_v16 = vld [vmem:[%s5550_s7 + $0x18] sm:$0xff] }
 0x15c   :  { %3976 = vpow2.f32 %v2469_v25  ;;  %v3411_v25 = vpack.c.bf16 %v2659_v16, %v2657_v30 }
 0x15e   :  { %3412 = vmatprep.subr.bf16.mxu1 %v3411_v25 }
 0x166   :  { %v3977_v31 = vpop.eup %3976 }
 0x167   :  { %v2471_v34 = vsel %vm2464_vm10, %v3977_v31, 0.0 }
 0x168   :  { %2472 = vadd.xlane.f32.xlu1 %v2471_v34  ;;  %v2658_v34 = vld [vmem:[%s5550_s7 + $0x10] sm:$0xff] }
 0x1f1   :  { %v2012_v36 = vpop.f32.mrb[0].mxu1 }
 0x1f2   :  { %v2014_v38 = vpop.f32.mrb[1].mxu1  ;;  %v3491_v57 = vadd.f32 %v2012_v36, %v345_v35  ;;  %v2822_v35 = vld [vmem:[%s5551_s10 + $0x80] sm:$0xff] }
 0x1f3   :  { %v2016_v47 = vpop.f32.mrb[2].mxu1  ;;  %v3493_v48 = vadd.f32 %v2014_v38, %v349_v4  ;;  %v2661_v38 = vld [vmem:[%s5550_s7 + $0x28] sm:$0xff] }
 0x1f4   :  { %v2017_v39 = vpop.f32.mrb[3].mxu1  ;;  %v2823_v4 = vld [vmem:[%s5551_s10 + $0x88] sm:$0xff] }
 0x1f5   :  { %v2473_v44 = vpop.xlane.xlu1 %2472  ;;  %v2660_v39 = vld [vmem:[%s5550_s7 + $0x20] sm:$0xff] }
 0x1f6   :  { %3978 = vrcp.f32 %v2473_v44  ;;  %v2663_v44 = vld [vmem:[%s5550_s7 + $0x38] sm:$0xff] }
 0x1f7   :  { %v3415_v47 = vpack.c.bf16 %v2663_v44, %v2661_v38 }
 0x200   :  { %v3979_v51 = vpop.eup %3978 }
 0x201   :  { %v2475_v52 = vmul.f32 %v3979_v51, %v3977_v31  ;;  %v2656_v31 = vld [vmem:[%s5550_s7] sm:$0xff]  ;;  %v2662_v51 = vld [vmem:[%s5550_s7 + $0x30] sm:$0xff] }
 0x202   :  { %v3413_v36 = vpack.c.bf16 %v2658_v34, %v2656_v31 }
 0x203   :  { %v5203_v42 = vmul.f32 %v2475_v52, %v4831_v56  ;;  %v3417_v52 = vpack.c.bf16 %v2662_v51, %v2660_v39 }
 0x204   :  { %3414 = vmatpush1.bf16.msra.mxu1 %v3413_v36 }
 0x205   :  { %v2513_v61 = vrot.slane %v5203_v42, %v2512_v26  ;;  %v2480_v63 = vrot.slane %v5203_v42, %v5200_v49  ;;  %v2524_v62 = vrot.slane %v5203_v42, %v2523_v60  ;;  %v2535_v56 = vrot.slane %v5203_v42, %v2534_v14  ;;  %3416 = vmatprep.subr.bf16.mxu1 %v3415_v47  ;;  %v2665_v26 = vld [vmem:[%s5550_s7 + $0x48] sm:$0xff]  ;;  %v2664_v60 = vld [vmem:[%s5550_s7 + $0x40] sm:$0xff] }
 0x206   :  { %v2491_v20 = vrot.slane %v5203_v42, %v5212_v3  ;;  %v2546_v27 = vrot.slane %v5203_v42, %v2545_v22  ;;  %v2557_v19 = vrot.slane %v5203_v42, %v2556_v29  ;;  %v2502_v53 = vrot.slane %v5203_v42, %v2501_v15 }
 0x207   :  { %2515 = vbcast.lane.b32.xlu0 %v2513_v61, 256  ;;  %2482 = vbcast.lane.b32.xlu1 %v2480_v63, 256  ;;  %v3981_v15 = vmov 0.0  }
 0x208   :  { %3418 = vmatpush1.bf16.msra.mxu1 %v3417_v52  ;;  %2767 = vmatprep.mubr.f32.mxu1 %v3981_v15 }
 0x20b   :  { %2526 = vbcast.lane.b32.xlu0 %v2524_v62, 256  ;;  %2486 = vbcast.lane.b32.xlu1 %v2480_v63, 264 }
 0x20f   :  { %2537 = vbcast.lane.b32.xlu0 %v2535_v56, 256  ;;  %2493 = vbcast.lane.b32.xlu1 %v2491_v20, 256 }
 0x213   :  { %2548 = vbcast.lane.b32.xlu0 %v2546_v27, 256  ;;  %2497 = vbcast.lane.b32.xlu1 %v2491_v20, 264  ;;  %v2671_v20 = vld [vmem:[%s5550_s7 + $0x78] sm:$0xff] }
 0x217   :  { %2559 = vbcast.lane.b32.xlu0 %v2557_v19, 256  ;;  %2504 = vbcast.lane.b32.xlu1 %v2502_v53, 256  ;;  %v2217_v13 = vpop.f32.mrb[0].mxu0 }
 0x218   :  { %v5228_v41 = vadd.f32 %v3491_v57, %v2217_v13  ;;  %v2219_v18 = vpop.f32.mrb[1].mxu0 }
 0x219   :  { %v5230_v17 = vadd.f32 %v3493_v48, %v2219_v18  ;;  %v2221_v21 = vpop.f32.mrb[2].mxu0 }
 0x21a   :  { %v2222_v1 = vpop.f32.mrb[3].mxu0 }
 0x21b   :  { %2508 = vbcast.lane.b32.xlu1 %v2502_v53, 264  ;;  %v2653_v53 = vsel %vm2464_vm10, %v5203_v42, 0.0 }
 0x21f   :  { %2519 = vbcast.lane.b32.xlu1 %v2513_v61, 264  ;;  %v2667_v61 = vld [vmem:[%s5550_s7 + $0x58] sm:$0xff] }
 0x220   :  { %v3419_v63 = vpack.c.bf16 %v2667_v61, %v2665_v26 }
 0x222   :  { %3420 = vmatprep.subr.bf16.mxu1 %v3419_v63 }
 0x223   :  { %2530 = vbcast.lane.b32.xlu1 %v2524_v62, 264  ;;  %v2666_v62 = vld [vmem:[%s5550_s7 + $0x50] sm:$0xff] }
 0x224   :  { %v3421_v14 = vpack.c.bf16 %v2666_v62, %v2664_v60 }
 0x226   :  { %3422 = vmatpush1.bf16.msra.mxu1 %v3421_v14 }
 0x227   :  { %2541 = vbcast.lane.b32.xlu1 %v2535_v56, 264  ;;  %v2669_v56 = vld [vmem:[%s5550_s7 + $0x68] sm:$0xff] }
 0x228   :  { %v3423_v22 = vpack.c.bf16 %v2671_v20, %v2669_v56 }
 0x22a   :  { %3424 = vmatprep.subr.bf16.mxu1 %v3423_v22 }
 0x22b   :  { %2552 = vbcast.lane.b32.xlu1 %v2546_v27, 264  ;;  %v2670_v27 = vld [vmem:[%s5550_s7 + $0x70] sm:$0xff] }
 0x22c   :  { %v3425_v29 = vpack.c.bf16 %v2670_v27, %v2668_v40 }
 0x22e   :  { %3426 = vmatpush1.bf16.msra.mxu1 %v3425_v29 }
 0x22f   :  { %2563 = vbcast.lane.b32.xlu1 %v2557_v19, 264  ;;  %v3427_v19 = vpack.c.bf16 %v2823_v4, %v2822_v35 }
 0x231   :  { %3428 = vmatprep.subr.bf16.mxu1 %v3427_v19 }
 0x236   :  { %2654 = vadd.xlane.f32.xlu0 %v2653_v53 }
 0x279   :  { %v2483_v57 = vpop.permute.xlu1 %2482  ;;  %v2516_v18 = vpop.permute.xlu0 %2515 }
 0x27a   :  { %v2565_v36 = vmul.f32 %v3304_v5, %v2483_v57 }
 0x27c   :  { %v2581_v5 = vsel %vm2280_vm0, %v2565_v36, 0.0 }
 0x27d   :  { %v2487_v48 = vpop.permute.xlu1 %2486  ;;  %v2527_v16 = vpop.permute.xlu0 %2526 }
 0x27e   :  { %v2566_v25 = vmul.f32 %v3305_v6, %v2487_v48  ;;  %v2573_v52 = vmul.f32 %v3320_v32, %v2527_v16 }
 0x280   :  { %v2582_v6 = vsel %vm2280_vm0, %v2566_v25, 0.0  ;;  %v2617_v11 = vsel %vm2280_vm0, %v2573_v52, 0.0 }
 0x281   :  { %v2494_v13 = vpop.permute.xlu1 %2493  ;;  %v2538_v47 = vpop.permute.xlu0 %2537 }
 0x282   :  { %v2567_v31 = vmul.f32 %v3308_v7, %v2494_v13 }
 0x284   :  { %v2590_v2 = vsel %vm2280_vm0, %v2567_v31, 0.0 }
 0x285   :  { %v2498_v21 = vpop.permute.xlu1 %2497  ;;  %v2549_v20 = vpop.permute.xlu0 %2548 }
 0x286   :  { %v2568_v30 = vmul.f32 %v3309_v9, %v2498_v21  ;;  %v2571_v9 = vmul.f32 %v3316_v23, %v2516_v18  ;;  %v2577_v53 = vmul.f32 %v3328_v50, %v2549_v20 }
 0x288   :  { %v2591_v38 = vsel %vm2280_vm0, %v2568_v30, 0.0  ;;  %v2608_v23 = vsel %vm2280_vm0, %v2571_v9, 0.0  ;;  %v2635_v25 = vsel %vm2280_vm0, %v2577_v53, 0.0 }
 0x289   :  { %v2505_v1 = vpop.permute.xlu1 %2504  ;;  %v2560_v48 = vpop.permute.xlu0 %2559 }
 0x28a   :  { %v2569_v42 = vmul.f32 %v3312_v10, %v2505_v1  ;;  %v2592_v10 = vadd.f32 %v2591_v38, %v2590_v2  ;;  %v2579_v31 = vmul.f32 %v3332_v58, %v2560_v48 }
 0x28c   :  { %v2599_v39 = vsel %vm2280_vm0, %v2569_v42, 0.0  ;;  %v2593_v61 = vrot.slane %v2592_v10, 4 }
 0x28d   :  { %v2509_v34 = vpop.permute.xlu1 %2508 }
 0x28e   :  { %v2570_v44 = vmul.f32 %v3313_v12, %v2509_v34  ;;  %v2583_v12 = vadd.f32 %v2582_v6, %v2581_v5  ;;  %v2594_v32 = vadd.f32 %v2593_v61, %v2592_v10 }
 0x290   :  { %v2600_v7 = vsel %vm2280_vm0, %v2570_v44, 0.0  ;;  %v2584_v56 = vrot.slane %v2583_v12, 4 }
 0x291   :  { %v2520_v0 = vpop.permute.xlu1 %2519  ;;  %v2601_v51 = vadd.f32 %v2600_v7, %v2599_v39 }
 0x292   :  { %v2572_v8 = vmul.f32 %v3317_v28, %v2520_v0  ;;  %v2575_v28 = vmul.f32 %v3324_v43, %v2538_v47  ;;  %v2585_v4 = vadd.f32 %v2584_v56, %v2583_v12  ;;  %v2595_v43 = vrot.slane %v2594_v32, 2 }
 0x293   :  { %v2602_v62 = vrot.slane %v2601_v51, 4  ;;  %v2644_v47 = vsel %vm2280_vm0, %v2579_v31, 0.0  ;;  %v2810_v31 = vld [vmem:[%s5551_s10 + $0x20] sm:$0xff] }
 0x294   :  { %v2609_v26 = vsel %vm2280_vm0, %v2572_v8, 0.0  ;;  %v2626_v19 = vsel %vm2280_vm0, %v2575_v28, 0.0  ;;  %v2596_v34 = vadd.f32 %v2595_v43, %v2594_v32 }
 0x295   :  { %v2610_v63 = vadd.f32 %v2609_v26, %v2608_v23  ;;  %v2531_v60 = vpop.permute.xlu1 %2530  ;;  %v2603_v15 = vadd.f32 %v2602_v62, %v2601_v51 }
 0x296   :  { %v2574_v14 = vmul.f32 %v3321_v37, %v2531_v60  ;;  %v2597_v39 = vrot.slane %v2596_v34, 1 }
 0x297   :  { %v2611_v22 = vrot.slane %v2610_v63, 4  ;;  %v2604_v1 = vrot.slane %v2603_v15, 2 }
 0x298   :  { %v2618_v40 = vsel %vm2280_vm0, %v2574_v14, 0.0 }
 0x299   :  { %v2619_v27 = vadd.f32 %v2618_v40, %v2617_v11  ;;  %v2542_v29 = vpop.permute.xlu1 %2541  ;;  %v2612_v24 = vadd.f32 %v2611_v22, %v2610_v63  ;;  %v2605_v9 = vadd.f32 %v2604_v1, %v2603_v15  ;;  %v2806_v15 = vld [vmem:[%s5551_s10] sm:$0xff]  ;;  %v2809_v1 = vld [vmem:[%s5551_s10 + $0x18] sm:$0xff] }
 0x29a   :  { %v2576_v35 = vmul.f32 %v3325_v46, %v2542_v29  ;;  %v2586_v46 = vrot.slane %v2585_v4, 2 }
 0x29b   :  { %v2620_v37 = vrot.slane %v2619_v27, 4  ;;  %v2613_v30 = vrot.slane %v2612_v24, 2  ;;  %v2606_v8 = vrot.slane %v2605_v9, 1 }
 0x29c   :  { %v2627_v57 = vsel %vm2280_vm0, %v2576_v35, 0.0  ;;  %v2807_v35 = vld [vmem:[%s5551_s10 + $0x8] sm:$0xff] }
 0x29d   :  { %v2621_v13 = vadd.f32 %v2620_v37, %v2619_v27  ;;  %v2628_v18 = vadd.f32 %v2627_v57, %v2626_v19  ;;  %v2553_v21 = vpop.permute.xlu1 %2552  ;;  %v2614_v6 = vadd.f32 %v2613_v30, %v2612_v24  ;;  %v2607_v62 = vadd.f32 %v2606_v8, %v2605_v9  ;;  %v2824_v37 = vld [vmem:[%s5551_s10 + $0x90] sm:$0xff]  ;;  %v2825_v19 = vld [vmem:[%s5551_s10 + $0x98] sm:$0xff]  ;;  %v2827_v30 = vld [vmem:[%s5551_s10 + $0xa8] sm:$0xff] }
 0x29e   :  { %v2578_v33 = vmul.f32 %v3329_v55, %v2553_v21  ;;  %v2587_v55 = vadd.f32 %v2586_v46, %v2585_v4  ;;  %v3429_v48 = vpack.c.bf16 %v2807_v35, %v2806_v15  ;;  %v2808_v21 = vld [vmem:[%s5551_s10 + $0x10] sm:$0xff]  ;;  %v2826_v46 = vld [vmem:[%s5551_s10 + $0xa0] sm:$0xff]  ;;  %v2835_v8 = vld [vmem:[%s5551_s10 + $0xe8] sm:$0xff] }
 0x29f   :  { %v2629_v16 = vrot.slane %v2628_v18, 4  ;;  %v2622_v50 = vrot.slane %v2621_v13, 2  ;;  %v2615_v23 = vrot.slane %v2614_v6, 1  ;;  %v2830_v9 = vld [vmem:[%s5551_s10 + $0xc0] sm:$0xff]  ;;  %v2776_v15 = vld [vmem:[%s5552_s9 + $0x10] sm:$0xff]  ;;  %v2777_v35 = vld [vmem:[%s5552_s9 + $0x18] sm:$0xff] }
 0x2a0   :  { %v2636_v42 = vsel %vm2280_vm0, %v2578_v33, 0.0  ;;  %v2588_v12 = vrot.slane %v2587_v55, 1 }
 0x2a1   :  { %v2630_v36 = vadd.f32 %v2629_v16, %v2628_v18  ;;  %v2637_v38 = vadd.f32 %v2636_v42, %v2635_v25  ;;  %v2564_v44 = vpop.permute.xlu1 %2563  ;;  %v2623_v10 = vadd.f32 %v2622_v50, %v2621_v13  ;;  %v2616_v56 = vadd.f32 %v2615_v23, %v2614_v6  ;;  %v2811_v50 = vld [vmem:[%s5551_s10 + $0x28] sm:$0xff]  ;;  %v2828_v42 = vld [vmem:[%s5551_s10 + $0xb0] sm:$0xff] }
 0x2a2   :  { %v2580_v45 = vmul.f32 %v3333_v59, %v2564_v44  ;;  %v2598_v59 = vadd.f32 %v2597_v39, %v2596_v34  ;;  %v2589_v14 = vadd.f32 %v2588_v12, %v2587_v55  ;;  %v3431_v18 = vpack.c.bf16 %v2825_v19, %v2824_v37  ;;  %v2829_v34 = vld [vmem:[%s5551_s10 + $0xb8] sm:$0xff] }
 0x2a3   :  { %v2631_v2 = vrot.slane %v2630_v36, 2  ;;  %v2638_v7 = vrot.slane %v2637_v38, 4  ;;  %v2624_v54 = vrot.slane %v2623_v10, 1  ;;  %v3433_v16 = vpack.c.bf16 %v2809_v1, %v2808_v21  ;;  %v2813_v44 = vld [vmem:[%s5551_s10 + $0x38] sm:$0xff]  ;;  %v2798_v1 = vld [vmem:[%s5552_s9 + $0xc0] sm:$0xff] }
 0x2a4   :  { %v2645_v58 = vsel %vm2280_vm0, %v2580_v45, 0.0  ;;  %v2694_v28 = vsel %vm2448_vm2, %v2598_v59, %v2589_v14  ;;  %v3435_v25 = vpack.c.bf16 %v2827_v30, %v2826_v46  ;;  %v2831_v45 = vld [vmem:[%s5551_s10 + $0xc8] sm:$0xff]  ;;  %v2837_v59 = vld [vmem:[%s5551_s10 + $0xf8] sm:$0xff]  ;;  %v2790_v14 = vld [vmem:[%s5552_s9 + $0x80] sm:$0xff]  ;;  %v3465_v37 = vpack.c.bf16 %v2777_v35, %v2776_v15 }
 0x2a5   :  { %v2632_v0 = vadd.f32 %v2631_v2, %v2630_v36  ;;  %v2639_v5 = vadd.f32 %v2638_v7, %v2637_v38  ;;  %v2646_v51 = vadd.f32 %v2645_v58, %v2644_v47  ;;  %v2625_v11 = vadd.f32 %v2624_v54, %v2623_v10  ;;  %v2812_v38 = vld [vmem:[%s5551_s10 + $0x30] sm:$0xff]  ;;  %v2814_v2 = vld [vmem:[%s5551_s10 + $0x40] sm:$0xff]  ;;  %v2815_v7 = vld [vmem:[%s5551_s10 + $0x48] sm:$0xff] }
 0x2a6   :  { %v2695_v27 = vsel %vm2450_vm3, %v2607_v62, %v2694_v28  ;;  %v3439_v36 = vpack.c.bf16 %v2829_v34, %v2828_v42  ;;  %v3441_v55 = vpack.c.bf16 %v2813_v44, %v2812_v38  ;;  %v3443_v6 = vpack.c.bf16 %v2831_v45, %v2830_v9  ;;  %v2832_v47 = vld [vmem:[%s5551_s10 + $0xd0] sm:$0xff]  ;;  %v2833_v10 = vld [vmem:[%s5551_s10 + $0xd8] sm:$0xff]  ;;  %v2775_v28 = vld [vmem:[%s5552_s9 + $0x8] sm:$0xff] }
 0x2a7   :  { %v2640_v52 = vrot.slane %v2639_v5, 2  ;;  %v2647_v26 = vrot.slane %v2646_v51, 4  ;;  %v2633_v61 = vrot.slane %v2632_v0, 1  ;;  %v2696_v4 = vsel %vm2452_vm4, %v2616_v56, %v2695_v27  ;;  %v2836_v54 = vld [vmem:[%s5551_s10 + $0xf0] sm:$0xff]  ;;  %v2821_v62 = vld [vmem:[%s5551_s10 + $0x78] sm:$0xff]  ;;  %v2791_v56 = vld [vmem:[%s5552_s9 + $0x88] sm:$0xff] }
 0x2a8   :  { %v2697_v53 = vsel %vm2454_vm5, %v2625_v11, %v2696_v4  ;;  %v3445_v58 = vpack.c.bf16 %v2815_v7, %v2814_v2  ;;  %v3447_v39 = vpack.c.bf16 %v2833_v10, %v2832_v47  ;;  %v2774_v11 = vld [vmem:[%s5552_s9] sm:$0xff]  ;;  %v2781_v21 = vld [vmem:[%s5552_s9 + $0x38] sm:$0xff]  ;;  %v2803_v44 = vld [vmem:[%s5552_s9 + $0xe8] sm:$0xff] }
 0x2a9   :  { %v2641_v63 = vadd.f32 %v2640_v52, %v2639_v5  ;;  %v2648_v60 = vadd.f32 %v2647_v26, %v2646_v51  ;;  %v2634_v40 = vadd.f32 %v2633_v61, %v2632_v0  ;;  %v2816_v0 = vld [vmem:[%s5551_s10 + $0x50] sm:$0xff]  ;;  %v2817_v5 = vld [vmem:[%s5551_s10 + $0x58] sm:$0xff]  ;;  %v2834_v51 = vld [vmem:[%s5551_s10 + $0xe0] sm:$0xff]  ;;  %v3461_v27 = vpack.c.bf16 %v2775_v28, %v2774_v11 }
 0x2aa   :  { %v3449_v12 = vpack.c.bf16 %v2817_v5, %v2816_v0  ;;  %v3451_v23 = vpack.c.bf16 %v2835_v8, %v2834_v51  ;;  %v2818_v52 = vld [vmem:[%s5551_s10 + $0x60] sm:$0xff]  ;;  %v2819_v26 = vld [vmem:[%s5551_s10 + $0x68] sm:$0xff]  ;;  %v2804_v7 = vld [vmem:[%s5552_s9 + $0xf0] sm:$0xff] }
 0x2ab   :  { %v2642_v20 = vrot.slane %v2641_v63, 1  ;;  %v2649_v22 = vrot.slane %v2648_v60, 2  ;;  %v2698_v43 = vsel %vm2456_vm6, %v2634_v40, %v2697_v53  ;;  %v3453_v61 = vpack.c.bf16 %v2819_v26, %v2818_v52  ;;  %v2792_v40 = vld [vmem:[%s5552_s9 + $0x90] sm:$0xff]  ;;  %v2794_v4 = vld [vmem:[%s5552_s9 + $0xa0] sm:$0xff]  ;;  %v2805_v47 = vld [vmem:[%s5552_s9 + $0xf8] sm:$0xff] }
 0x2ac   :  { %v2778_v53 = vld [vmem:[%s5552_s9 + $0x20] sm:$0xff]  ;;  %v3487_v10 = vpack.c.bf16 %v2805_v47, %v2804_v7 }
 0x2ad   :  { %v2650_v32 = vadd.f32 %v2649_v22, %v2648_v60  ;;  %v2643_v29 = vadd.f32 %v2642_v20, %v2641_v63  ;;  %v3455_v63 = vpack.c.bf16 %v2837_v59, %v2836_v54  ;;  %v2820_v60 = vld [vmem:[%s5551_s10 + $0x70] sm:$0xff]  ;;  %v3459_v22 = vpack.c.bf16 %v2791_v56, %v2790_v14  ;;  %v2802_v38 = vld [vmem:[%s5552_s9 + $0xe0] sm:$0xff] }
 0x2ae   :  { %v3457_v20 = vpack.c.bf16 %v2821_v62, %v2820_v60  ;;  %v3483_v45 = vpack.c.bf16 %v2803_v44, %v2802_v38  ;;  %v2672_v5 = vld [vmem:[%s5553_s8] sm:$0x3] }
 0x2af   :  { %v2651_v24 = vrot.slane %v2650_v32, 1  ;;  %v2699_v13 = vsel %vm2458_vm7, %v2643_v29, %v2698_v43  ;;  %v2796_v43 = vld [vmem:[%s5552_s9 + $0xb0] sm:$0xff]  ;;  %v2681_v51 = vrot.slane %v2672_v5, %v5212_v3  ;;  %v2677_v8 = vrot.slane %v2672_v5, %v5200_v49  ;;  %v3301_v3 = vld [vmem:[%s5554_s11] ss:$0 sm:$0xff] }
 0x2b1   :  { %v2652_v57 = vadd.f32 %v2651_v24, %v2650_v32  ;;  %v2793_v32 = vld [vmem:[%s5552_s9 + $0x98] sm:$0xff]  ;;  %v2795_v24 = vld [vmem:[%s5552_s9 + $0xa8] sm:$0xff] }
 0x2b2   :  { %v3463_v29 = vpack.c.bf16 %v2793_v32, %v2792_v40  ;;  %v3467_v19 = vpack.c.bf16 %v2795_v24, %v2794_v4 }
 0x2b3   :  { %v2700_v33 = vsel %vm2460_vm8, %v2652_v57, %v2699_v13  ;;  %v2779_v57 = vld [vmem:[%s5552_s9 + $0x28] sm:$0xff] }
 0x2b4   :  { %3300 = vmatmul.mubr.msk.f32.vlgmr.msra.gmra.mrb[4].mxu1 %vm2280_vm0, %v2700_v33  ;;  %v2799_v33 = vld [vmem:[%s5552_s9 + $0xc8] sm:$0xff] }
 0x2b5   :  { %3430 = vmatpush3.bf16.msra.mxu1 %v3429_v48  ;;  %2902 = vmatprep.mubr.f32.mxu1 %v5230_v17  ;;  %v3437_v17 = vpack.c.bf16 %v2811_v50, %v2810_v31  ;;  %v3469_v48 = vpack.c.bf16 %v2779_v57, %v2778_v53  ;;  %v3475_v30 = vpack.c.bf16 %v2799_v33, %v2798_v1  ;;  %v2800_v31 = vld [vmem:[%s5552_s9 + $0xd0] sm:$0xff]  ;;  %v2801_v50 = vld [vmem:[%s5552_s9 + $0xd8] sm:$0xff] }
 0x2b6   :  { %3432 = vmatprep.subr.bf16.mxu1 %v3431_v18  ;;  %v2780_v18 = vld [vmem:[%s5552_s9 + $0x30] sm:$0xff]  ;;  %v3479_v34 = vpack.c.bf16 %v2801_v50, %v2800_v31 }
 0x2b7   :  { %v3473_v46 = vpack.c.bf16 %v2781_v21, %v2780_v18 }
 0x2b9   :  { %3434 = vmatpush3.bf16.msra.mxu1 %v3433_v16  ;;  %v2782_v16 = vld [vmem:[%s5552_s9 + $0x40] sm:$0xff] }
 0x2ba   :  { %3436 = vmatprep.subr.bf16.mxu1 %v3435_v25  ;;  %v2783_v25 = vld [vmem:[%s5552_s9 + $0x48] sm:$0xff] }
 0x2bb   :  { %v3477_v42 = vpack.c.bf16 %v2783_v25, %v2782_v16 }
 0x2bd   :  { %3438 = vmatpush3.bf16.msra.mxu1 %v3437_v17  ;;  %v2784_v17 = vld [vmem:[%s5552_s9 + $0x50] sm:$0xff] }
 0x2be   :  { %3440 = vmatprep.subr.bf16.mxu1 %v3439_v36  ;;  %v2785_v36 = vld [vmem:[%s5552_s9 + $0x58] sm:$0xff] }
 0x2bf   :  { %v3481_v9 = vpack.c.bf16 %v2785_v36, %v2784_v17 }
 0x2c1   :  { %3442 = vmatpush3.bf16.msra.mxu1 %v3441_v55  ;;  %v2786_v55 = vld [vmem:[%s5552_s9 + $0x60] sm:$0xff] }
 0x2c2   :  { %3444 = vmatprep.subr.bf16.mxu1 %v3443_v6  ;;  %v2787_v6 = vld [vmem:[%s5552_s9 + $0x68] sm:$0xff] }
 0x2c3   :  { %v3485_v2 = vpack.c.bf16 %v2787_v6, %v2786_v55 }
 0x2c5   :  { %3446 = vmatpush3.bf16.msra.mxu1 %v3445_v58  ;;  %v2788_v58 = vld [vmem:[%s5552_s9 + $0x70] sm:$0xff] }
 0x2c6   :  { %3448 = vmatprep.subr.bf16.mxu1 %v3447_v39  ;;  %v2789_v39 = vld [vmem:[%s5552_s9 + $0x78] sm:$0xff] }
 0x2c7   :  { %v3489_v0 = vpack.c.bf16 %v2789_v39, %v2788_v58 }
 0x2c9   :  { %3450 = vmatpush3.bf16.msra.mxu1 %v3449_v12  ;;  %v2655_v12 = vpop.xlane.xlu0 %2654 }
 0x2ca   :  { %3452 = vmatprep.subr.bf16.mxu1 %v3451_v23  ;;  %v2685_v23 = vmul.f32 %v2681_v51, %v2655_v12  ;;  %v2684_v26 = vmul.f32 %v2677_v8, %v2655_v12 }
 0x2cd   :  { %3454 = vmatpush3.bf16.msra.mxu1 %v3453_v61 }
 0x2ce   :  { %3456 = vmatprep.subr.bf16.mxu1 %v3455_v63 }
 0x2d1   :  { %3458 = vmatpush3.bf16.msra.mxu1 %v3457_v20 }
 0x2d2   :  { %3460 = vmatprep.subr.bf16.mxu1 %v3459_v22 }
 0x2d4   :  { %2903 = vmatmul.mubr.f32.vlgmr.msra.gmra.mrb[6].mxu1 %v5228_v41  ;;  %v2797_v41 = vld [vmem:[%s5552_s9 + $0xb8] sm:$0xff] }
 0x2d5   :  { %3462 = vmatpush3.bf16.msra.mxu1 %v3461_v27  ;;  %v3471_v13 = vpack.c.bf16 %v2797_v41, %v2796_v43 }
 0x2d6   :  { %3464 = vmatprep.subr.bf16.mxu1 %v3463_v29 }
 0x2d9   :  { %3466 = vmatpush3.bf16.msra.mxu1 %v3465_v37 }
 0x2da   :  { %3468 = vmatprep.subr.bf16.mxu1 %v3467_v19 }
 0x2dd   :  { %3470 = vmatpush3.bf16.msra.mxu1 %v3469_v48 }
 0x2de   :  { %3472 = vmatprep.subr.bf16.mxu1 %v3471_v13 }
 0x2e1   :  { %3474 = vmatpush3.bf16.msra.mxu1 %v3473_v46 }
 0x2e2   :  { %3476 = vmatprep.subr.bf16.mxu1 %v3475_v30 }
 0x2e5   :  { %3478 = vmatpush3.bf16.msra.mxu1 %v3477_v42 }
 0x2e6   :  { %3480 = vmatprep.subr.bf16.mxu1 %v3479_v34 }
 0x2e9   :  { %3482 = vmatpush3.bf16.msra.mxu1 %v3481_v9 }
 0x2ea   :  { %3484 = vmatprep.subr.bf16.mxu1 %v3483_v45 }
 0x2ed   :  { %3486 = vmatpush3.bf16.msra.mxu1 %v3485_v2 }
 0x2ee   :  { %3488 = vmatprep.subr.bf16.mxu1 %v3487_v10 }
 0x2f1   :  { %3490 = vmatpush3.bf16.msra.mxu1 %v3489_v0 }
 0x387   :  { %v2769_v52 = vpop.f32.mrb[4].mxu1 }
 0x388   :  { %v2771_v54 = vpop.f32.mrb[5].mxu1  ;;  %v2770_v61 = vadd.f32 %v2769_v52, %v2684_v26 }
 0x389   :  { %v2772_v59 = vadd.f32 %v2771_v54, %v2685_v23 }
 0x38b   :  { %2972 = vmatprep.mubr.f32.mxu1 %v2772_v59 }
 0x38c   :  { %2973 = vmatmul.mubr.f32.vlgmr.msra.gmra.mrb[8].mxu1 %v2770_v61 }
 0x3a7   :  { %v3373_v63 = vpop.f32.mrb[6].mxu1 }
 0x3a8   :  { %v3374_v60 = vpop.f32.mrb[7].mxu1 }
 0x3a9   :  { %v3375_v62 = vadd.f32 %v3374_v60, %v3373_v63 }
 0x45f   :  { %v3408_v14 = vpop.f32.mrb[8].mxu1 }
 0x460   :  { %v3409_v56 = vpop.f32.mrb[9].mxu1 }
 0x461   :  { %v3410_v20 = vadd.f32 %v3409_v56, %v3408_v14 }
 0x463   :  { %v2975_v49 = vadd.f32 %v3410_v20, %v3375_v62 }
 0x465   :  { %v2985_v22 = vadd.f32 %v3301_v3, %v2975_v49 }
 0x467   :  { %2987 = vst.msk [vmem:[%s5555_s12] sm:$0xff] %vm2986_vm11, %v2985_v22 }

</bundles_post_ra>
